<compile_context>
chip_gen: v7x
topology: tpu7x:2x2x1
jax: 0.10.0
libtpu: 0.0.40
codegen_flags: <defaults>
</compile_context>

<pallas_src>
import numpy as np
import jax
import jax.numpy as jnp
from jax.experimental import pallas as pl
from jax.experimental.pallas import tpu as pltpu

GN_EPS = 1e-5

_VMEM_LIMIT = None


def vmem_limit():
    """Per-generation VMEM budget (v5e/v6e: 128 MiB, v7x: 64 MiB per TC)."""
    global _VMEM_LIMIT
    if _VMEM_LIMIT is None:
        try:
            cap = int(pltpu.get_tpu_info().vmem_capacity_bytes)
            _VMEM_LIMIT = min(int(cap * 0.7), 100 * 1024 * 1024)
        except Exception:
            _VMEM_LIMIT = 48 * 1024 * 1024
    return _VMEM_LIMIT


# ----------------------------------------------------------------------------
# Geometry: canonical halo layout = (N, C, Mp), Mp = (D+2)(H+2)(W+2), voxel
# (d,h,w) (0-based) lives at (d+1)*HpWp + (h+1)*Wp + (w+1).  "core" = Lc lanes
# starting at off (the centre tap); latent tensors use core-only (C, Lc).
# ----------------------------------------------------------------------------
def make_geom(D, H, W):
    Dp, Hp, Wp = D + 2, H + 2, W + 2
    Mp = Dp * Hp * Wp
    off = Hp * Wp + Wp + 1
    Lc = Mp - 2 * off
    q = np.arange(off, off + Lc)
    d = q // (Hp * Wp)
    r = q % (Hp * Wp)
    h = r // Wp
    w = r % Wp
    valid = (d >= 1) & (d <= D) & (h >= 1) & (h <= H) & (w >= 1) & (w <= W)
    mask = jnp.asarray(valid.astype(np.float32)[None, :])          # (1, Lc)
    return dict(D=D, H=H, W=W, Dp=Dp, Hp=Hp, Wp=Wp, Mp=Mp, off=off, Lc=Lc,
                Mv=D * H * W, mask=mask)


def taps3(Hp, Wp):
    return tuple(kd * Hp * Wp + kh * Wp + kw
                 for kd in range(3) for kh in range(3) for kw in range(3))


def act_dtype(c):
    # review: keep narrow-channel (<16) activations in f32 — bf16 would only
    # half-fill the packed (16, 128) sublane tile.
    return jnp.float32 if c < 16 else jnp.bfloat16


def compute_dtype(*sublane_units):
    # bf16 im2col staging only when every sublane offset used in the staged
    # tiles is a multiple of 16 (full packed-tile alignment); else f32.
    return (jnp.bfloat16 if all(int(c) % 16 == 0 for c in sublane_units)
            else jnp.float32)


def to_canonical(x_ndhwc, geom):
    N, D, H, W, C = x_ndhwc.shape
    x = jnp.transpose(x_ndhwc, (0, 4, 1, 2, 3))
    x = jnp.pad(x, ((0, 0), (0, 0), (1, 1), (1, 1), (1, 1)))
    return x.reshape(N, C, geom["Mp"]).astype(act_dtype(C))


def from_canonical(y_can, geom, channels_last=True, dtype=None):
    N, C, _ = y_can.shape
    y = y_can.reshape(N, C, geom["Dp"], geom["Hp"], geom["Wp"])
    y = y[:, :, 1:1 + geom["D"], 1:1 + geom["H"], 1:1 + geom["W"]]
    if channels_last:
        y = jnp.transpose(y, (0, 2, 3, 4, 1))
    if dtype is not None:
        y = y.astype(dtype)
    return y


def from_core(y_core, geom, dtype=jnp.float32):
    N, C, Lc = y_core.shape
    off, Mp = geom["off"], geom["Mp"]
    y = jnp.pad(y_core, ((0, 0), (0, 0), (off, Mp - off - Lc)))
    return from_canonical(y, geom, channels_last=True, dtype=dtype)


def group_matrix(cout, num_groups):
    g = cout // num_groups
    c = np.arange(cout)
    return jnp.asarray((c[:, None] // g == c[None, :] // g).astype(np.float32))


# ----------------------------------------------------------------------------
# In-kernel helpers
# ----------------------------------------------------------------------------
def _gn_silu(acc, mask, gamma, beta, gmat, inv_cnt):
    """Exact GroupNorm over valid voxels (centred two-pass stats) + SiLU.

    NOTE: the tiny (C,C)@(C,1) group-sum matmuls stay on the MXU — the
    lane/sublane reshape alternative is riskier to lower and the cost is
    negligible next to the deep conv matmul.
    """
    s1 = jnp.sum(acc * mask, axis=1, keepdims=True)
    mean = jnp.dot(gmat, s1, preferred_element_type=jnp.float32) * inv_cnt
    cen = (acc - mean) * mask
    s2 = jnp.sum(cen * cen, axis=1, keepdims=True)
    var = jnp.dot(gmat, s2, preferred_element_type=jnp.float32) * inv_cnt
    y = (acc - mean) * jax.lax.rsqrt(var + GN_EPS)
    y = y * gamma + beta
    return y * jax.nn.sigmoid(y)


def _store_halo(ref, val, off, Lc, Mp, dtype):
    """Single-pass full-width write: left zeros | core | right zeros (Mp lanes
    of stores total — no zero-fill-then-rewrite of the core region)."""
    C = val.shape[0]
    zl = jnp.zeros((C, off), dtype)
    zr = jnp.zeros((C, Mp - off - Lc), dtype)
    v = val.astype(dtype)
    if len(ref.shape) == 3:                 # (1, C, Mp) output block
        ref[0, :, :off] = zl
        ref[0, :, pl.ds(off, Lc)] = v
        ref[0, :, off + Lc:] = zr
    else:                                   # (C, Mp) VMEM scratch
        ref[:, :off] = zl
        ref[:, pl.ds(off, Lc)] = v
        ref[:, off + Lc:] = zr


# ----------------------------------------------------------------------------
# Fused ResBlock kernel:
#   conv_res(1x1) + conv1(3x3x3)+GN+SiLU + conv2(3x3x3)+GN+SiLU + residual,
#   optional second input (skip concat replacement), optional fused 1x1
#   upsample conv as auxiliary output.  h1 stays in VMEM.
# ----------------------------------------------------------------------------
def make_resblock_kernel(*, tap_starts, off, Lc, Mp, C1, C2, Cout, Caux,
                         write_main, inv_cnt, out_dtype, aux_dtype):
    T = len(tap_starts)
    Ct = C1 + C2
    ci = tap_starts.index(off)                     # centre tap index

    def kernel(*refs):
        it = iter(refs)
        x1_ref = next(it)
        x2_ref = next(it) if C2 > 0 else None
        w1_ref = next(it); b1_ref = next(it); g1_ref = next(it); be1_ref = next(it)
        w2_ref = next(it); b2_ref = next(it); g2_ref = next(it); be2_ref = next(it)
        wr_ref = next(it); br_ref = next(it)
        gmat_ref = next(it); mask_ref = next(it)
        if Caux > 0:
            wa_ref = next(it); ba_ref = next(it)
        o_ref = next(it) if write_main else None
        oa_ref = next(it) if Caux > 0 else None
        im1_ref = next(it)                         # (T*Ct, Lc)   im2col (conv1)
        h1_ref = next(it)                          # (Cout, Mp)   halo scratch
        im2_ref = next(it)                         # (T*Cout, Lc) im2col (conv2)

        cdt = w1_ref.dtype
        mask = mask_ref[...]
        gmat = gmat_ref[...]

        # ---- stage im2col for conv1 (27 lane-shifted slices of the inputs) -
        for t in range(T):
            st = tap_starts[t]
            im1_ref[t * Ct:t * Ct + C1, :] = (
                x1_ref[0, :, pl.ds(st, Lc)].astype(cdt))
            if C2 > 0:
                im1_ref[t * Ct + C1:(t + 1) * Ct, :] = (
                    x2_ref[0, :, pl.ds(st, Lc)].astype(cdt))

        # ---- conv_res (1x1): reuse the centre-tap rows already staged ------
        xc = im1_ref[ci * Ct:(ci + 1) * Ct, :]
        res = jnp.dot(wr_ref[...], xc, preferred_element_type=jnp.float32)
        res = (res + br_ref[...]) * mask

        # ---- conv1 as ONE deep-contraction matmul + GN + SiLU --------------
        acc1 = jnp.dot(w1_ref[...], im1_ref[...],
                       preferred_element_type=jnp.float32) + b1_ref[...]
        h1 = _gn_silu(acc1, mask, g1_ref[...], be1_ref[...], gmat, inv_cnt)
        _store_halo(h1_ref, h1 * mask, off, Lc, Mp, cdt)

        # ---- conv2 as ONE deep-contraction matmul + GN + SiLU + residual ---
        for t in range(T):
            st = tap_starts[t]
            im2_ref[t * Cout:(t + 1) * Cout, :] = h1_ref[:, pl.ds(st, Lc)]
        acc2 = jnp.dot(w2_ref[...], im2_ref[...],
                       preferred_element_type=jnp.float32) + b2_ref[...]
        y = _gn_silu(acc2, mask, g2_ref[...], be2_ref[...], gmat, inv_cnt)
        y = (y + res) * mask

        if write_main:
            _store_halo(o_ref, y, off, Lc, Mp, out_dtype)
        if Caux > 0:
            # fused PixelShuffleUpsample3D 1x1 conv
            aux = jnp.dot(wa_ref[...], y.astype(cdt),
                          preferred_element_type=jnp.float32) + ba_ref[...]
            _store_halo(oa_ref, aux * mask, off, Lc, Mp, aux_dtype)

    return kernel


def resblock_call(bp, x1, x2, geom, num_groups, aux=None, write_main=True):
    N, C1, Mp = x1.shape
    assert Mp == geom["Mp"]
    C2 = 0 if x2 is None else x2.shape[1]
    Ct = C1 + C2
    Cout = bp["conv1"]["cout"]
    Caux = 0 if aux is None else aux["cout"]
    assert write_main or Caux > 0
    assert Cout % num_groups == 0
    off, Lc = geom["off"], geom["Lc"]
    taps = taps3(geom["Hp"], geom["Wp"])
    T = len(taps)
    chans = [Ct, Cout] + ([C1] if C2 > 0 else [])
    cdt = compute_dtype(*chans)
    out_dtype = act_dtype(Cout)
    aux_dtype = act_dtype(Caux) if Caux > 0 else jnp.float32
    inv_cnt = 1.0 / float((Cout // num_groups) * geom["Mv"])

    args = [x1]
    in_specs = [pl.BlockSpec((1, C1, Mp), lambda n: (n, 0, 0))]
    if C2 > 0:
        args.append(x2)
        in_specs.append(pl.BlockSpec((1, C2, Mp), lambda n: (n, 0, 0)))

    def _full(a):
        args.append(a)
        in_specs.append(pl.BlockSpec(a.shape, lambda n, _nd=a.ndim: (0,) * _nd))

    _full(bp["conv1"]["w2d"].astype(cdt)); _full(bp["conv1"]["b"])
    _full(bp["conv1"]["gamma"]); _full(bp["conv1"]["beta"])
    _full(bp["conv2"]["w2d"].astype(cdt)); _full(bp["conv2"]["b"])
    _full(bp["conv2"]["gamma"]); _full(bp["conv2"]["beta"])
    _full(bp["conv_res"]["w2d"].astype(cdt)); _full(bp["conv_res"]["b"])
    _full(group_matrix(Cout, num_groups))
    _full(geom["mask"])
    if Caux > 0:
        _full(aux["w2d"].astype(cdt)); _full(aux["b"])

    out_shape, out_specs = [], []
    if write_main:
        out_shape.append(jax.ShapeDtypeStruct((N, Cout, Mp), out_dtype))
        out_specs.append(pl.BlockSpec((1, Cout, Mp), lambda n: (n, 0, 0)))
    if Caux > 0:
        out_shape.append(jax.ShapeDtypeStruct((N, Caux, Mp), aux_dtype))
        out_specs.append(pl.BlockSpec((1, Caux, Mp), lambda n: (n, 0, 0)))

    scratch = [pltpu.VMEM((T * Ct, Lc), cdt),
               pltpu.VMEM((Cout, Mp), cdt),
               pltpu.VMEM((T * Cout, Lc), cdt)]

    flops = 2 * N * Lc * (T * Ct * Cout + T * Cout * Cout
                          + Ct * Cout + Caux * Cout + 4 * Cout)
    trans = N * Lc * 2 * Cout
    bytes_acc = sum(int(np.prod(a.shape)) * a.dtype.itemsize for a in args)
    bytes_acc += sum(int(np.prod(s.shape)) * np.dtype(s.dtype).itemsize
                     for s in out_shape)

    kernel = make_resblock_kernel(
        tap_starts=taps, off=off, Lc=Lc, Mp=Mp, C1=C1, C2=C2, Cout=Cout,
        Caux=Caux, write_main=write_main, inv_cnt=inv_cnt,
        out_dtype=out_dtype, aux_dtype=aux_dtype)

    outs = pl.pallas_call(
        kernel,
        out_shape=tuple(out_shape),
        grid=(N,),
        in_specs=in_specs,
        out_specs=tuple(out_specs),
        scratch_shapes=scratch,
        compiler_params=pltpu.CompilerParams(
            dimension_semantics=("parallel",),
            vmem_limit_bytes=vmem_limit()),
        cost_estimate=pl.CostEstimate(flops=int(flops),
                                      transcendentals=int(trans),
                                      bytes_accessed=int(bytes_acc)),
    )(*args)
    outs = list(outs) if isinstance(outs, (list, tuple)) else [outs]
    if write_main and Caux > 0:
        return outs[0], outs[1]
    return outs[0]


# ----------------------------------------------------------------------------
# Fused LatentEncoder kernel:
#   3x3x3 pre-conv + GN + SiLU + combined (2L,C) 1x1 head + prior add +
#   sigma + KL (+ fused LatentDecoder 1x1 conv for the posterior path).
#   Latent tensors are emitted core-only (C, Lc).
# ----------------------------------------------------------------------------
def make_latent_encoder_kernel(*, tap_starts, off, Lc, Mp, Cin, L, Cdec,
                               has_prior, emit_lv, emit_kl, inv_cnt, dec_dtype):
    T = len(tap_starts)

    def kernel(*refs):
        it = iter(refs)
        x_ref = next(it)
        wp_ref = next(it); bp_ref = next(it); gp_ref = next(it); bep_ref = next(it)
        gmat_ref = next(it)
        wh_ref = next(it); bh_ref = next(it)
        mask_ref = next(it)
        if has_prior:
            pmu_ref = next(it); plv_ref = next(it)
        if Cdec > 0:
            wd_ref = next(it); bd_ref = next(it)
        mu_ref = next(it); sig_ref = next(it)
        lv_ref = next(it) if emit_lv else None
        kl_ref = next(it) if emit_kl else None
        dec_ref = next(it) if Cdec > 0 else None
        im_ref = next(it)                          # (T*Cin, Lc) im2col staging

        cdt = wp_ref.dtype
        mask = mask_ref[...]
        valid = mask > 0.0

        # ---- pre conv (3x3x3) + GN + SiLU, one deep-contraction matmul -----
        for t in range(T):
            im_ref[t * Cin:(t + 1) * Cin, :] = (
                x_ref[0, :, pl.ds(tap_starts[t], Lc)].astype(cdt))
        acc = jnp.dot(wp_ref[...], im_ref[...],
                      preferred_element_type=jnp.float32) + bp_ref[...]
        h = _gn_silu(acc, mask, gp_ref[...], bep_ref[...], gmat_ref[...],
                     inv_cnt)

        # ---- combined (2L, Cmid) head: one matmul then split rows ----------
        head = jnp.dot(wh_ref[...], h, preferred_element_type=jnp.float32)
        head = head + bh_ref[...]
        mu = head[:L, :]
        lv = head[L:, :]
        if has_prior:
            pmu = pmu_ref[0]
            plv = plv_ref[0]
            mu = mu + pmu
            lv = lv + plv
            dmu = mu - pmu
            kl = (0.5 * (plv - lv - 1.0)
                  + (jnp.exp(lv) + dmu * dmu) * (0.5 * jnp.exp(-plv)))
        else:
            kl = 0.5 * (mu * mu + jnp.exp(lv) - 1.0 - lv)
        sig = jnp.exp(0.5 * lv)

        mu_m = jnp.where(valid, mu, 0.0)
        mu_ref[0] = mu_m
        sig_ref[0] = jnp.where(valid, sig, 0.0)
        if emit_lv:
            lv_ref[0] = jnp.where(valid, lv, 0.0)
        if emit_kl:
            kl_ref[0] = jnp.where(valid, kl, 0.0)
        if Cdec > 0:
            # fused LatentDecoder 1x1 conv on latent == posterior_mu
            dec = jnp.dot(wd_ref[...], mu_m,
                          preferred_element_type=jnp.float32) + bd_ref[...]
            _store_halo(dec_ref, jnp.where(valid, dec, 0.0),
                        off, Lc, Mp, dec_dtype)

    return kernel


def latent_encoder_call(p, x_can, geom, num_groups, prior=None, dec=None,
                        emit_lv=False, emit_kl=False):
    N, Cin, Mp = x_can.shape
    Cmid = p["pre"]["cout"]
    L = p["head"]["cout"] // 2
    Cdec = 0 if dec is None else dec["cout"]
    assert Cmid % num_groups == 0
    off, Lc = geom["off"], geom["Lc"]
    taps = taps3(geom["Hp"], geom["Wp"])
    T = len(taps)
    cdt = compute_dtype(Cin)
    dec_dtype = act_dtype(Cdec) if Cdec > 0 else jnp.float32
    inv_cnt = 1.0 / float((Cmid // num_groups) * geom["Mv"])

    args = [x_can]
    in_specs = [pl.BlockSpec((1, Cin, Mp), lambda n: (n, 0, 0))]

    def _full(a):
        args.append(a)
        in_specs.append(pl.BlockSpec(a.shape, lambda n, _nd=a.ndim: (0,) * _nd))

    _full(p["pre"]["w2d"].astype(cdt)); _full(p["pre"]["b"])
    _full(p["pre"]["gamma"]); _full(p["pre"]["beta"])
    _full(group_matrix(Cmid, num_groups))
    _full(p["head"]["w2d"]); _full(p["head"]["b"])          # f32 head
    _full(geom["mask"])
    has_prior = prior is not None
    if has_prior:
        for t in prior:                                     # (pmu, plv) core
            args.append(t)
            in_specs.append(pl.BlockSpec((1, L, Lc), lambda n: (n, 0, 0)))
    if Cdec > 0:
        _full(dec["w2d"]); _full(dec["b"])                  # f32 decoder

    out_shape = [jax.ShapeDtypeStruct((N, L, Lc), jnp.float32),
                 jax.ShapeDtypeStruct((N, L, Lc), jnp.float32)]
    if emit_lv:
        out_shape.append(jax.ShapeDtypeStruct((N, L, Lc), jnp.float32))
    if emit_kl:
        out_shape.append(jax.ShapeDtypeStruct((N, L, Lc), jnp.float32))
    if Cdec > 0:
        out_shape.append(jax.ShapeDtypeStruct((N, Cdec, Mp), dec_dtype))
    out_specs = []
    for s in out_shape:
        blk = (1,) + tuple(s.shape[1:])
        out_specs.append(pl.BlockSpec(blk, lambda n: (n, 0, 0)))

    scratch = [pltpu.VMEM((T * Cin, Lc), cdt)]

    flops = 2 * N * Lc * (T * Cin * Cmid + 2 * L * Cmid + Cdec * L + 4 * Cmid)
    trans = N * Lc * (Cmid + 4 * L)
    bytes_acc = sum(int(np.prod(a.shape)) * a.dtype.itemsize for a in args)
    bytes_acc += sum(int(np.prod(s.shape)) * np.dtype(s.dtype).itemsize
                     for s in out_shape)

    kernel = make_latent_encoder_kernel(
        tap_starts=taps, off=off, Lc=Lc, Mp=Mp, Cin=Cin, L=L, Cdec=Cdec,
        has_prior=has_prior, emit_lv=emit_lv, emit_kl=emit_kl,
        inv_cnt=inv_cnt, dec_dtype=dec_dtype)

    outs = pl.pallas_call(
        kernel,
        out_shape=tuple(out_shape),
        grid=(N,),
        in_specs=in_specs,
        out_specs=tuple(out_specs),
        scratch_shapes=scratch,
        compiler_params=pltpu.CompilerParams(
            dimension_semantics=("parallel",),
            vmem_limit_bytes=vmem_limit()),
        cost_estimate=pl.CostEstimate(flops=int(flops),
                                      transcendentals=int(trans),
                                      bytes_accessed=int(bytes_acc)),
    )(*args)
    return tuple(outs)


# ----------------------------------------------------------------------------
# Thin JAX orchestration (stage loop, pixel shuffle, latent ops)
# ----------------------------------------------------------------------------
def pixel_shuffle_upsample(y_can, geom, geom_up):
    # TODO(synk): fold the (2,2,2) sub-voxel scatter into the conv writeback
    #             (8 strided core stores) instead of this XLA transpose chain.
    N = y_can.shape[0]
    cout = y_can.shape[1] // 8
    D, H, W = geom["D"], geom["H"], geom["W"]
    y = from_canonical(y_can, geom, channels_last=False)   # (N, 8c, D, H, W)
    y = y.reshape(N, cout, 2, 2, 2, D, H, W)
    y = jnp.transpose(y, (0, 1, 5, 2, 6, 3, 7, 4))          # N,c,D,2,H,2,W,2
    y = y.reshape(N, cout, 2 * D, 2 * H, 2 * W)
    assert (2 * D, 2 * H, 2 * W) == (geom_up["D"], geom_up["H"], geom_up["W"])
    y = jnp.pad(y, ((0, 0), (0, 0), (1, 1), (1, 1), (1, 1)))
    return y.reshape(N, cout, geom_up["Mp"]).astype(act_dtype(cout))


def stage_forward(stage_p, x1_can, x2_can, geom, geom_up, num_groups):
    blocks = stage_p["blocks"]
    up = stage_p["upsample"]
    for bi, bp in enumerate(blocks):
        fuse_up = (bi == len(blocks) - 1) and (up is not None)
        out = resblock_call(bp, x1_can, x2_can, geom, num_groups,
                            aux=up if fuse_up else None,
                            write_main=not fuse_up)
        if fuse_up:
            return pixel_shuffle_upsample(out, geom, geom_up)
        x1_can, x2_can = out, None
    return x1_can


def decoder_forward(params, encodings, config):
    n = len(encodings)
    num_groups = config["num_groups"]
    geoms = [make_geom(e.shape[1], e.shape[2], e.shape[3]) for e in encodings]
    latents = [None] * n
    kls = [None] * n
    priors = [(None, None)] * n
    posts = [(None, None)] * n
    prev_can = None
    for i in range(n - 1, -1, -1):
        geom = geoms[i]
        le = params["latent_encoders"][i]
        if le is None:
            x1, x2 = prev_can, None
        else:
            enc_can = to_canonical(encodings[i], geom)
            if i == n - 1:
                prior = None
            else:
                pmu, psig, plv = latent_encoder_call(
                    params["prior_estimators"][i], prev_can, geom, num_groups,
                    emit_lv=True)
                prior = (pmu, plv)
                priors[i] = (from_core(pmu, geom), from_core(psig, geom))
            mu, sig, kl, dec_can = latent_encoder_call(
                le, enc_can, geom, num_groups, prior=prior,
                dec=params["latent_decoders"][i]["conv"], emit_kl=True)
            # deterministic eval path (force_sampling=False): latent = mu
            latents[i] = from_core(mu, geom)
            kls[i] = from_core(kl, geom)
            posts[i] = (latents[i], from_core(sig, geom))
            if prev_can is None:
                x1, x2 = dec_can, None
            else:
                x1, x2 = dec_can, prev_can          # concat replaced by 2 refs
        prev_can = stage_forward(params["stages"][i], x1, x2, geom,
                                 geoms[i - 1] if i > 0 else None, num_groups)
    decoder_output = from_canonical(prev_can, geoms[0], dtype=jnp.float32)
    return decoder_output, latents, kls, priors, posts


# ----------------------------------------------------------------------------
# Deterministic parameter construction (weights stored f32, cast per-call)
# ----------------------------------------------------------------------------
def init_conv(key, K, cin, cout):
    k1, k2, k3, k4 = jax.random.split(key, 4)
    T = K ** 3
    fan_in = T * cin
    w = jax.random.normal(k1, (T, cout, cin), jnp.float32) / np.sqrt(fan_in)
    w2d = jnp.transpose(w, (1, 0, 2)).reshape(cout, T * cin)   # tap-major cols
    b = 0.01 * jax.random.normal(k2, (cout, 1), jnp.float32)
    gamma = 1.0 + 0.05 * jax.random.normal(k3, (cout, 1), jnp.float32)
    beta = 0.05 * jax.random.normal(k4, (cout, 1), jnp.float32)
    return dict(w2d=w2d, b=b, gamma=gamma, beta=beta, K=K, cin=cin, cout=cout)


def build_decoder_params(key, config):
    depths = config["depths"]
    num_channels = config["num_channels"]
    latent_dims = config["latent_dims"]
    n = len(depths)
    keys = iter(jax.random.split(key, 256))
    params = {"stages": [], "latent_encoders": [None] * n,
              "latent_decoders": [None] * n, "prior_estimators": [None] * n}
    for i in range(n):
        ch = num_channels[i]
        depth = depths[i]
        has_skip = (latent_dims[i] is not None) and (i != n - 1)
        in_chs = [ch] * depth
        if has_skip:
            in_chs[0] = ch * 2
        blocks = []
        for cin in in_chs:
            blocks.append({
                "conv_res": init_conv(next(keys), 1, cin, ch),
                "conv1": init_conv(next(keys), 3, cin, ch),
                "conv2": init_conv(next(keys), 3, ch, ch),
            })
        stage = {"blocks": blocks, "upsample": None}
        if i > 0:
            stage["upsample"] = init_conv(next(keys), 1, ch,
                                          num_channels[i - 1] * 8)
        params["stages"].append(stage)
        if latent_dims[i] is not None:
            ld = latent_dims[i]
            params["latent_encoders"][i] = {
                "pre": init_conv(next(keys), 3, ch, ch),
                "head": init_conv(next(keys), 1, ch, 2 * ld),
            }
            params["latent_decoders"][i] = {
                "conv": init_conv(next(keys), 1, ld, ch)}
            if i != n - 1:
                params["prior_estimators"][i] = {
                    "pre": init_conv(next(keys), 3, ch, ch),
                    "head": init_conv(next(keys), 1, ch, 2 * ld),
                }
    return params


# ----------------------------------------------------------------------------
if __name__ == "__main__":
    config = dict(depths=[1, 1], num_channels=[8, 16], latent_dims=[4, 4],
                  num_groups=4)
    key = jax.random.PRNGKey(0)
    pkey, e0key, e1key = jax.random.split(key, 3)
    params = build_decoder_params(pkey, config)

    N = 2
    # encodings[i]: NDHWC, spatial halves per stage (stage 1 is the deepest).
    enc0 = jax.random.normal(e0key, (N, 8, 8, 8, config["num_channels"][0]),
                             jnp.float32)
    enc1 = jax.random.normal(e1key, (N, 4, 4, 4, config["num_channels"][1]),
                             jnp.float32)
    encodings = [enc0, enc1]

    out, latents, kls, priors, posts = decoder_forward(params, encodings,
                                                       config)
    out = jax.block_until_ready(out)
    for kl in kls:
        if kl is not None:
            jax.block_until_ready(kl)

    assert out.shape == (N, 8, 8, 8, config["num_channels"][0])
    assert latents[0].shape == (N, 8, 8, 8, 4)
    assert latents[1].shape == (N, 4, 4, 4, 4)
    assert kls[0].shape == (N, 8, 8, 8, 4)
    assert priors[0][0].shape == (N, 8, 8, 8, 4)
    assert posts[1][1].shape == (N, 4, 4, 4, 4)
    assert bool(jnp.isfinite(out).all())
    assert all(bool(jnp.isfinite(k).all()) for k in kls if k is not None)
    print("KERNEL_OK")
</pallas_src>

<mosaic_0001>
module attributes {stable_mosaic.version = 11 : i64} {
  func.func @kernel(%arg0: i32, %arg1: memref<1x16x216xbf16, #tpu.memory_space<vmem>>, %arg2: memref<16x432xbf16, #tpu.memory_space<vmem>>, %arg3: memref<16x1xf32, #tpu.memory_space<vmem>>, %arg4: memref<16x1xf32, #tpu.memory_space<vmem>>, %arg5: memref<16x1xf32, #tpu.memory_space<vmem>>, %arg6: memref<16x16xf32, #tpu.memory_space<vmem>>, %arg7: memref<8x16xf32, #tpu.memory_space<vmem>>, %arg8: memref<8x1xf32, #tpu.memory_space<vmem>>, %arg9: memref<1x130xf32, #tpu.memory_space<vmem>>, %arg10: memref<16x4xf32, #tpu.memory_space<vmem>>, %arg11: memref<16x1xf32, #tpu.memory_space<vmem>>, %arg12: memref<1x4x130xf32, #tpu.memory_space<vmem>>, %arg13: memref<1x4x130xf32, #tpu.memory_space<vmem>>, %arg14: memref<1x4x130xf32, #tpu.memory_space<vmem>>, %arg15: memref<1x16x216xbf16, #tpu.memory_space<vmem>>, %arg16: memref<432x130xbf16, #tpu.memory_space<vmem>>) attributes {dimension_semantics = [#tpu.dimension_semantics<parallel>], iteration_bounds = array<i64: 2>, scalar_prefetch = 0 : i64, scratch_operands = 1 : i64, tpu.core_type = #tpu.core_type<tc>, window_params = [{transform_indices = @transform_0, window_bounds = array<i64: 1, 16, 216>}, {pipeline_mode = #tpu.pipeline_mode<synchronous>, transform_indices = @transform_1, window_bounds = array<i64: 16, 432>}, {pipeline_mode = #tpu.pipeline_mode<synchronous>, transform_indices = @transform_2, window_bounds = array<i64: 16, 1>}, {pipeline_mode = #tpu.pipeline_mode<synchronous>, transform_indices = @transform_3, window_bounds = array<i64: 16, 1>}, {pipeline_mode = #tpu.pipeline_mode<synchronous>, transform_indices = @transform_4, window_bounds = array<i64: 16, 1>}, {pipeline_mode = #tpu.pipeline_mode<synchronous>, transform_indices = @transform_5, window_bounds = array<i64: 16, 16>}, {pipeline_mode = #tpu.pipeline_mode<synchronous>, transform_indices = @transform_6, window_bounds = array<i64: 8, 16>}, {pipeline_mode = #tpu.pipeline_mode<synchronous>, transform_indices = @transform_7, window_bounds = array<i64: 8, 1>}, {pipeline_mode = #tpu.pipeline_mode<synchronous>, transform_indices = @transform_8, window_bounds = array<i64: 1, 130>}, {pipeline_mode = #tpu.pipeline_mode<synchronous>, transform_indices = @transform_9, window_bounds = array<i64: 16, 4>}, {pipeline_mode = #tpu.pipeline_mode<synchronous>, transform_indices = @transform_10, window_bounds = array<i64: 16, 1>}, {transform_indices = @transform_11, window_bounds = array<i64: 1, 4, 130>}, {transform_indices = @transform_12, window_bounds = array<i64: 1, 4, 130>}, {transform_indices = @transform_13, window_bounds = array<i64: 1, 4, 130>}, {transform_indices = @transform_14, window_bounds = array<i64: 1, 16, 216>}]} {
    %c0 = arith.constant 0 : index
    %c0_0 = arith.constant 0 : index
    %0 = vector.load %arg9[%c0, %c0_0] : memref<1x130xf32, #tpu.memory_space<vmem>>, vector<1x130xf32>
    %cst = arith.constant 0.000000e+00 : f32
    %1 = vector.broadcast %cst : f32 to vector<1x130xf32>
    %2 = arith.cmpf ogt, %0, %1 : vector<1x130xf32>
    %c0_1 = arith.constant 0 : index
    %c0_2 = arith.constant 0 : index
    %c0_3 = arith.constant 0 : index
    %3 = vector.load %arg1[%c0_1, %c0_2, %c0_3] : memref<1x16x216xbf16, #tpu.memory_space<vmem>>, vector<1x16x130xbf16>
    %4 = vector.shape_cast %3 : vector<1x16x130xbf16> to vector<16x130xbf16>
    %c0_4 = arith.constant 0 : index
    %c0_5 = arith.constant 0 : index
    %5 = vector.load %arg16[%c0_4, %c0_5] : memref<432x130xbf16, #tpu.memory_space<vmem>>, vector<16x130xbf16>
    tpu.vector_store %arg16[%c0_4, %c0_5], %4 {strides = array<i32>} : memref<432x130xbf16, #tpu.memory_space<vmem>>, vector<16x130xbf16>,
    %c0_6 = arith.constant 0 : index
    %c0_7 = arith.constant 0 : index
    %c1 = arith.constant 1 : index
    %6 = vector.load %arg1[%c0_6, %c0_7, %c1] : memref<1x16x216xbf16, #tpu.memory_space<vmem>>, vector<1x16x130xbf16>
    %7 = vector.shape_cast %6 : vector<1x16x130xbf16> to vector<16x130xbf16>
    %c16 = arith.constant 16 : index
    %c0_8 = arith.constant 0 : index
    %8 = vector.load %arg16[%c16, %c0_8] : memref<432x130xbf16, #tpu.memory_space<vmem>>, vector<16x130xbf16>
    tpu.vector_store %arg16[%c16, %c0_8], %7 {strides = array<i32>} : memref<432x130xbf16, #tpu.memory_space<vmem>>, vector<16x130xbf16>,
    %c0_9 = arith.constant 0 : index
    %c0_10 = arith.constant 0 : index
    %c2 = arith.constant 2 : index
    %9 = vector.load %arg1[%c0_9, %c0_10, %c2] : memref<1x16x216xbf16, #tpu.memory_space<vmem>>, vector<1x16x130xbf16>
    %10 = vector.shape_cast %9 : vector<1x16x130xbf16> to vector<16x130xbf16>
    %c32 = arith.constant 32 : index
    %c0_11 = arith.constant 0 : index
    %11 = vector.load %arg16[%c32, %c0_11] : memref<432x130xbf16, #tpu.memory_space<vmem>>, vector<16x130xbf16>
    tpu.vector_store %arg16[%c32, %c0_11], %10 {strides = array<i32>} : memref<432x130xbf16, #tpu.memory_space<vmem>>, vector<16x130xbf16>,
    %c0_12 = arith.constant 0 : index
    %c0_13 = arith.constant 0 : index
    %c6 = arith.constant 6 : index
    %12 = vector.load %arg1[%c0_12, %c0_13, %c6] : memref<1x16x216xbf16, #tpu.memory_space<vmem>>, vector<1x16x130xbf16>
    %13 = vector.shape_cast %12 : vector<1x16x130xbf16> to vector<16x130xbf16>
    %c48 = arith.constant 48 : index
    %c0_14 = arith.constant 0 : index
    %14 = vector.load %arg16[%c48, %c0_14] : memref<432x130xbf16, #tpu.memory_space<vmem>>, vector<16x130xbf16>
    tpu.vector_store %arg16[%c48, %c0_14], %13 {strides = array<i32>} : memref<432x130xbf16, #tpu.memory_space<vmem>>, vector<16x130xbf16>,
    %c0_15 = arith.constant 0 : index
    %c0_16 = arith.constant 0 : index
    %c7 = arith.constant 7 : index
    %15 = vector.load %arg1[%c0_15, %c0_16, %c7] : memref<1x16x216xbf16, #tpu.memory_space<vmem>>, vector<1x16x130xbf16>
    %16 = vector.shape_cast %15 : vector<1x16x130xbf16> to vector<16x130xbf16>
    %c64 = arith.constant 64 : index
    %c0_17 = arith.constant 0 : index
    %17 = vector.load %arg16[%c64, %c0_17] : memref<432x130xbf16, #tpu.memory_space<vmem>>, vector<16x130xbf16>
    tpu.vector_store %arg16[%c64, %c0_17], %16 {strides = array<i32>} : memref<432x130xbf16, #tpu.memory_space<vmem>>, vector<16x130xbf16>,
    %c0_18 = arith.constant 0 : index
    %c0_19 = arith.constant 0 : index
    %c8 = arith.constant 8 : index
    %18 = vector.load %arg1[%c0_18, %c0_19, %c8] : memref<1x16x216xbf16, #tpu.memory_space<vmem>>, vector<1x16x130xbf16>
    %19 = vector.shape_cast %18 : vector<1x16x130xbf16> to vector<16x130xbf16>
    %c80 = arith.constant 80 : index
    %c0_20 = arith.constant 0 : index
    %20 = vector.load %arg16[%c80, %c0_20] : memref<432x130xbf16, #tpu.memory_space<vmem>>, vector<16x130xbf16>
    tpu.vector_store %arg16[%c80, %c0_20], %19 {strides = array<i32>} : memref<432x130xbf16, #tpu.memory_space<vmem>>, vector<16x130xbf16>,
    %c0_21 = arith.constant 0 : index
    %c0_22 = arith.constant 0 : index
    %c12 = arith.constant 12 : index
    %21 = vector.load %arg1[%c0_21, %c0_22, %c12] : memref<1x16x216xbf16, #tpu.memory_space<vmem>>, vector<1x16x130xbf16>
    %22 = vector.shape_cast %21 : vector<1x16x130xbf16> to vector<16x130xbf16>
    %c96 = arith.constant 96 : index
    %c0_23 = arith.constant 0 : index
    %23 = vector.load %arg16[%c96, %c0_23] : memref<432x130xbf16, #tpu.memory_space<vmem>>, vector<16x130xbf16>
    tpu.vector_store %arg16[%c96, %c0_23], %22 {strides = array<i32>} : memref<432x130xbf16, #tpu.memory_space<vmem>>, vector<16x130xbf16>,
    %c0_24 = arith.constant 0 : index
    %c0_25 = arith.constant 0 : index
    %c13 = arith.constant 13 : index
    %24 = vector.load %arg1[%c0_24, %c0_25, %c13] : memref<1x16x216xbf16, #tpu.memory_space<vmem>>, vector<1x16x130xbf16>
    %25 = vector.shape_cast %24 : vector<1x16x130xbf16> to vector<16x130xbf16>
    %c112 = arith.constant 112 : index
    %c0_26 = arith.constant 0 : index
    %26 = vector.load %arg16[%c112, %c0_26] : memref<432x130xbf16, #tpu.memory_space<vmem>>, vector<16x130xbf16>
    tpu.vector_store %arg16[%c112, %c0_26], %25 {strides = array<i32>} : memref<432x130xbf16, #tpu.memory_space<vmem>>, vector<16x130xbf16>,
    %c0_27 = arith.constant 0 : index
    %c0_28 = arith.constant 0 : index
    %c14 = arith.constant 14 : index
    %27 = vector.load %arg1[%c0_27, %c0_28, %c14] : memref<1x16x216xbf16, #tpu.memory_space<vmem>>, vector<1x16x130xbf16>
    %28 = vector.shape_cast %27 : vector<1x16x130xbf16> to vector<16x130xbf16>
    %c128 = arith.constant 128 : index
    %c0_29 = arith.constant 0 : index
    %29 = vector.load %arg16[%c128, %c0_29] : memref<432x130xbf16, #tpu.memory_space<vmem>>, vector<16x130xbf16>
    tpu.vector_store %arg16[%c128, %c0_29], %28 {strides = array<i32>} : memref<432x130xbf16, #tpu.memory_space<vmem>>, vector<16x130xbf16>,
    %c0_30 = arith.constant 0 : index
    %c0_31 = arith.constant 0 : index
    %c36 = arith.constant 36 : index
    %30 = vector.load %arg1[%c0_30, %c0_31, %c36] : memref<1x16x216xbf16, #tpu.memory_space<vmem>>, vector<1x16x130xbf16>
    %31 = vector.shape_cast %30 : vector<1x16x130xbf16> to vector<16x130xbf16>
    %c144 = arith.constant 144 : index
    %c0_32 = arith.constant 0 : index
    %32 = vector.load %arg16[%c144, %c0_32] : memref<432x130xbf16, #tpu.memory_space<vmem>>, vector<16x130xbf16>
    tpu.vector_store %arg16[%c144, %c0_32], %31 {strides = array<i32>} : memref<432x130xbf16, #tpu.memory_space<vmem>>, vector<16x130xbf16>,
    %c0_33 = arith.constant 0 : index
    %c0_34 = arith.constant 0 : index
    %c37 = arith.constant 37 : index
    %33 = vector.load %arg1[%c0_33, %c0_34, %c37] : memref<1x16x216xbf16, #tpu.memory_space<vmem>>, vector<1x16x130xbf16>
    %34 = vector.shape_cast %33 : vector<1x16x130xbf16> to vector<16x130xbf16>
    %c160 = arith.constant 160 : index
    %c0_35 = arith.constant 0 : index
    %35 = vector.load %arg16[%c160, %c0_35] : memref<432x130xbf16, #tpu.memory_space<vmem>>, vector<16x130xbf16>
    tpu.vector_store %arg16[%c160, %c0_35], %34 {strides = array<i32>} : memref<432x130xbf16, #tpu.memory_space<vmem>>, vector<16x130xbf16>,
    %c0_36 = arith.constant 0 : index
    %c0_37 = arith.constant 0 : index
    %c38 = arith.constant 38 : index
    %36 = vector.load %arg1[%c0_36, %c0_37, %c38] : memref<1x16x216xbf16, #tpu.memory_space<vmem>>, vector<1x16x130xbf16>
    %37 = vector.shape_cast %36 : vector<1x16x130xbf16> to vector<16x130xbf16>
    %c176 = arith.constant 176 : index
    %c0_38 = arith.constant 0 : index
    %38 = vector.load %arg16[%c176, %c0_38] : memref<432x130xbf16, #tpu.memory_space<vmem>>, vector<16x130xbf16>
    tpu.vector_store %arg16[%c176, %c0_38], %37 {strides = array<i32>} : memref<432x130xbf16, #tpu.memory_space<vmem>>, vector<16x130xbf16>,
    %c0_39 = arith.constant 0 : index
    %c0_40 = arith.constant 0 : index
    %c42 = arith.constant 42 : index
    %39 = vector.load %arg1[%c0_39, %c0_40, %c42] : memref<1x16x216xbf16, #tpu.memory_space<vmem>>, vector<1x16x130xbf16>
    %40 = vector.shape_cast %39 : vector<1x16x130xbf16> to vector<16x130xbf16>
    %c192 = arith.constant 192 : index
    %c0_41 = arith.constant 0 : index
    %41 = vector.load %arg16[%c192, %c0_41] : memref<432x130xbf16, #tpu.memory_space<vmem>>, vector<16x130xbf16>
    tpu.vector_store %arg16[%c192, %c0_41], %40 {strides = array<i32>} : memref<432x130xbf16, #tpu.memory_space<vmem>>, vector<16x130xbf16>,
    %c0_42 = arith.constant 0 : index
    %c0_43 = arith.constant 0 : index
    %c43 = arith.constant 43 : index
    %42 = vector.load %arg1[%c0_42, %c0_43, %c43] : memref<1x16x216xbf16, #tpu.memory_space<vmem>>, vector<1x16x130xbf16>
    %43 = vector.shape_cast %42 : vector<1x16x130xbf16> to vector<16x130xbf16>
    %c208 = arith.constant 208 : index
    %c0_44 = arith.constant 0 : index
    %44 = vector.load %arg16[%c208, %c0_44] : memref<432x130xbf16, #tpu.memory_space<vmem>>, vector<16x130xbf16>
    tpu.vector_store %arg16[%c208, %c0_44], %43 {strides = array<i32>} : memref<432x130xbf16, #tpu.memory_space<vmem>>, vector<16x130xbf16>,
    %c0_45 = arith.constant 0 : index
    %c0_46 = arith.constant 0 : index
    %c44 = arith.constant 44 : index
    %45 = vector.load %arg1[%c0_45, %c0_46, %c44] : memref<1x16x216xbf16, #tpu.memory_space<vmem>>, vector<1x16x130xbf16>
    %46 = vector.shape_cast %45 : vector<1x16x130xbf16> to vector<16x130xbf16>
    %c224 = arith.constant 224 : index
    %c0_47 = arith.constant 0 : index
    %47 = vector.load %arg16[%c224, %c0_47] : memref<432x130xbf16, #tpu.memory_space<vmem>>, vector<16x130xbf16>
    tpu.vector_store %arg16[%c224, %c0_47], %46 {strides = array<i32>} : memref<432x130xbf16, #tpu.memory_space<vmem>>, vector<16x130xbf16>,
    %c0_48 = arith.constant 0 : index
    %c0_49 = arith.constant 0 : index
    %c48_50 = arith.constant 48 : index
    %48 = vector.load %arg1[%c0_48, %c0_49, %c48_50] : memref<1x16x216xbf16, #tpu.memory_space<vmem>>, vector<1x16x130xbf16>
    %49 = vector.shape_cast %48 : vector<1x16x130xbf16> to vector<16x130xbf16>
    %c240 = arith.constant 240 : index
    %c0_51 = arith.constant 0 : index
    %50 = vector.load %arg16[%c240, %c0_51] : memref<432x130xbf16, #tpu.memory_space<vmem>>, vector<16x130xbf16>
    tpu.vector_store %arg16[%c240, %c0_51], %49 {strides = array<i32>} : memref<432x130xbf16, #tpu.memory_space<vmem>>, vector<16x130xbf16>,
    %c0_52 = arith.constant 0 : index
    %c0_53 = arith.constant 0 : index
    %c49 = arith.constant 49 : index
    %51 = vector.load %arg1[%c0_52, %c0_53, %c49] : memref<1x16x216xbf16, #tpu.memory_space<vmem>>, vector<1x16x130xbf16>
    %52 = vector.shape_cast %51 : vector<1x16x130xbf16> to vector<16x130xbf16>
    %c256 = arith.constant 256 : index
    %c0_54 = arith.constant 0 : index
    %53 = vector.load %arg16[%c256, %c0_54] : memref<432x130xbf16, #tpu.memory_space<vmem>>, vector<16x130xbf16>
    tpu.vector_store %arg16[%c256, %c0_54], %52 {strides = array<i32>} : memref<432x130xbf16, #tpu.memory_space<vmem>>, vector<16x130xbf16>,
    %c0_55 = arith.constant 0 : index
    %c0_56 = arith.constant 0 : index
    %c50 = arith.constant 50 : index
    %54 = vector.load %arg1[%c0_55, %c0_56, %c50] : memref<1x16x216xbf16, #tpu.memory_space<vmem>>, vector<1x16x130xbf16>
    %55 = vector.shape_cast %54 : vector<1x16x130xbf16> to vector<16x130xbf16>
    %c272 = arith.constant 272 : index
    %c0_57 = arith.constant 0 : index
    %56 = vector.load %arg16[%c272, %c0_57] : memref<432x130xbf16, #tpu.memory_space<vmem>>, vector<16x130xbf16>
    tpu.vector_store %arg16[%c272, %c0_57], %55 {strides = array<i32>} : memref<432x130xbf16, #tpu.memory_space<vmem>>, vector<16x130xbf16>,
    %c0_58 = arith.constant 0 : index
    %c0_59 = arith.constant 0 : index
    %c72 = arith.constant 72 : index
    %57 = vector.load %arg1[%c0_58, %c0_59, %c72] : memref<1x16x216xbf16, #tpu.memory_space<vmem>>, vector<1x16x130xbf16>
    %58 = vector.shape_cast %57 : vector<1x16x130xbf16> to vector<16x130xbf16>
    %c288 = arith.constant 288 : index
    %c0_60 = arith.constant 0 : index
    %59 = vector.load %arg16[%c288, %c0_60] : memref<432x130xbf16, #tpu.memory_space<vmem>>, vector<16x130xbf16>
    tpu.vector_store %arg16[%c288, %c0_60], %58 {strides = array<i32>} : memref<432x130xbf16, #tpu.memory_space<vmem>>, vector<16x130xbf16>,
    %c0_61 = arith.constant 0 : index
    %c0_62 = arith.constant 0 : index
    %c73 = arith.constant 73 : index
    %60 = vector.load %arg1[%c0_61, %c0_62, %c73] : memref<1x16x216xbf16, #tpu.memory_space<vmem>>, vector<1x16x130xbf16>
    %61 = vector.shape_cast %60 : vector<1x16x130xbf16> to vector<16x130xbf16>
    %c304 = arith.constant 304 : index
    %c0_63 = arith.constant 0 : index
    %62 = vector.load %arg16[%c304, %c0_63] : memref<432x130xbf16, #tpu.memory_space<vmem>>, vector<16x130xbf16>
    tpu.vector_store %arg16[%c304, %c0_63], %61 {strides = array<i32>} : memref<432x130xbf16, #tpu.memory_space<vmem>>, vector<16x130xbf16>,
    %c0_64 = arith.constant 0 : index
    %c0_65 = arith.constant 0 : index
    %c74 = arith.constant 74 : index
    %63 = vector.load %arg1[%c0_64, %c0_65, %c74] : memref<1x16x216xbf16, #tpu.memory_space<vmem>>, vector<1x16x130xbf16>
    %64 = vector.shape_cast %63 : vector<1x16x130xbf16> to vector<16x130xbf16>
    %c320 = arith.constant 320 : index
    %c0_66 = arith.constant 0 : index
    %65 = vector.load %arg16[%c320, %c0_66] : memref<432x130xbf16, #tpu.memory_space<vmem>>, vector<16x130xbf16>
    tpu.vector_store %arg16[%c320, %c0_66], %64 {strides = array<i32>} : memref<432x130xbf16, #tpu.memory_space<vmem>>, vector<16x130xbf16>,
    %c0_67 = arith.constant 0 : index
    %c0_68 = arith.constant 0 : index
    %c78 = arith.constant 78 : index
    %66 = vector.load %arg1[%c0_67, %c0_68, %c78] : memref<1x16x216xbf16, #tpu.memory_space<vmem>>, vector<1x16x130xbf16>
    %67 = vector.shape_cast %66 : vector<1x16x130xbf16> to vector<16x130xbf16>
    %c336 = arith.constant 336 : index
    %c0_69 = arith.constant 0 : index
    %68 = vector.load %arg16[%c336, %c0_69] : memref<432x130xbf16, #tpu.memory_space<vmem>>, vector<16x130xbf16>
    tpu.vector_store %arg16[%c336, %c0_69], %67 {strides = array<i32>} : memref<432x130xbf16, #tpu.memory_space<vmem>>, vector<16x130xbf16>,
    %c0_70 = arith.constant 0 : index
    %c0_71 = arith.constant 0 : index
    %c79 = arith.constant 79 : index
    %69 = vector.load %arg1[%c0_70, %c0_71, %c79] : memref<1x16x216xbf16, #tpu.memory_space<vmem>>, vector<1x16x130xbf16>
    %70 = vector.shape_cast %69 : vector<1x16x130xbf16> to vector<16x130xbf16>
    %c352 = arith.constant 352 : index
    %c0_72 = arith.constant 0 : index
    %71 = vector.load %arg16[%c352, %c0_72] : memref<432x130xbf16, #tpu.memory_space<vmem>>, vector<16x130xbf16>
    tpu.vector_store %arg16[%c352, %c0_72], %70 {strides = array<i32>} : memref<432x130xbf16, #tpu.memory_space<vmem>>, vector<16x130xbf16>,
    %c0_73 = arith.constant 0 : index
    %c0_74 = arith.constant 0 : index
    %c80_75 = arith.constant 80 : index
    %72 = vector.load %arg1[%c0_73, %c0_74, %c80_75] : memref<1x16x216xbf16, #tpu.memory_space<vmem>>, vector<1x16x130xbf16>
    %73 = vector.shape_cast %72 : vector<1x16x130xbf16> to vector<16x130xbf16>
    %c368 = arith.constant 368 : index
    %c0_76 = arith.constant 0 : index
    %74 = vector.load %arg16[%c368, %c0_76] : memref<432x130xbf16, #tpu.memory_space<vmem>>, vector<16x130xbf16>
    tpu.vector_store %arg16[%c368, %c0_76], %73 {strides = array<i32>} : memref<432x130xbf16, #tpu.memory_space<vmem>>, vector<16x130xbf16>,
    %c0_77 = arith.constant 0 : index
    %c0_78 = arith.constant 0 : index
    %c84 = arith.constant 84 : index
    %75 = vector.load %arg1[%c0_77, %c0_78, %c84] : memref<1x16x216xbf16, #tpu.memory_space<vmem>>, vector<1x16x130xbf16>
    %76 = vector.shape_cast %75 : vector<1x16x130xbf16> to vector<16x130xbf16>
    %c384 = arith.constant 384 : index
    %c0_79 = arith.constant 0 : index
    %77 = vector.load %arg16[%c384, %c0_79] : memref<432x130xbf16, #tpu.memory_space<vmem>>, vector<16x130xbf16>
    tpu.vector_store %arg16[%c384, %c0_79], %76 {strides = array<i32>} : memref<432x130xbf16, #tpu.memory_space<vmem>>, vector<16x130xbf16>,
    %c0_80 = arith.constant 0 : index
    %c0_81 = arith.constant 0 : index
    %c85 = arith.constant 85 : index
    %78 = vector.load %arg1[%c0_80, %c0_81, %c85] : memref<1x16x216xbf16, #tpu.memory_space<vmem>>, vector<1x16x130xbf16>
    %79 = vector.shape_cast %78 : vector<1x16x130xbf16> to vector<16x130xbf16>
    %c400 = arith.constant 400 : index
    %c0_82 = arith.constant 0 : index
    %80 = vector.load %arg16[%c400, %c0_82] : memref<432x130xbf16, #tpu.memory_space<vmem>>, vector<16x130xbf16>
    tpu.vector_store %arg16[%c400, %c0_82], %79 {strides = array<i32>} : memref<432x130xbf16, #tpu.memory_space<vmem>>, vector<16x130xbf16>,
    %c0_83 = arith.constant 0 : index
    %c0_84 = arith.constant 0 : index
    %c86 = arith.constant 86 : index
    %81 = vector.load %arg1[%c0_83, %c0_84, %c86] : memref<1x16x216xbf16, #tpu.memory_space<vmem>>, vector<1x16x130xbf16>
    %82 = vector.shape_cast %81 : vector<1x16x130xbf16> to vector<16x130xbf16>
    %c416 = arith.constant 416 : index
    %c0_85 = arith.constant 0 : index
    %83 = vector.load %arg16[%c416, %c0_85] : memref<432x130xbf16, #tpu.memory_space<vmem>>, vector<16x130xbf16>
    tpu.vector_store %arg16[%c416, %c0_85], %82 {strides = array<i32>} : memref<432x130xbf16, #tpu.memory_space<vmem>>, vector<16x130xbf16>,
    %c0_86 = arith.constant 0 : index
    %c0_87 = arith.constant 0 : index
    %84 = vector.load %arg2[%c0_86, %c0_87] : memref<16x432xbf16, #tpu.memory_space<vmem>>, vector<16x432xbf16>
    %c0_88 = arith.constant 0 : index
    %c0_89 = arith.constant 0 : index
    %85 = vector.load %arg16[%c0_88, %c0_89] : memref<432x130xbf16, #tpu.memory_space<vmem>>, vector<432x130xbf16>
    %cst_90 = arith.constant dense<0.000000e+00> : vector<16x130xf32>
    %86 = tpu.matmul %84, %85, %cst_90 {dimension_numbers = #tpu.dot_dimension_numbers<[1], [0], [0], [1], [0, 0, 1, 1], [], []>} : vector<16x432xbf16>, vector<432x130xbf16>, vector<16x130xf32> -> vector<16x130xf32>
    %c0_91 = arith.constant 0 : index
    %c0_92 = arith.constant 0 : index
    %87 = vector.load %arg3[%c0_91, %c0_92] : memref<16x1xf32, #tpu.memory_space<vmem>>, vector<16x1xf32>
    %88 = vector.broadcast %87 : vector<16x1xf32> to vector<16x130xf32>
    %89 = arith.addf %86, %88 : vector<16x130xf32>
    %c0_93 = arith.constant 0 : index
    %c0_94 = arith.constant 0 : index
    %90 = vector.load %arg4[%c0_93, %c0_94] : memref<16x1xf32, #tpu.memory_space<vmem>>, vector<16x1xf32>
    %c0_95 = arith.constant 0 : index
    %c0_96 = arith.constant 0 : index
    %91 = vector.load %arg5[%c0_95, %c0_96] : memref<16x1xf32, #tpu.memory_space<vmem>>, vector<16x1xf32>
    %c0_97 = arith.constant 0 : index
    %c0_98 = arith.constant 0 : index
    %92 = vector.load %arg6[%c0_97, %c0_98] : memref<16x16xf32, #tpu.memory_space<vmem>>, vector<16x16xf32>
    %93 = vector.broadcast %0 : vector<1x130xf32> to vector<16x130xf32>
    %94 = arith.mulf %89, %93 : vector<16x130xf32>
    %cst_99 = arith.constant dense<0.000000e+00> : vector<16xf32>
    %95 = vector.multi_reduction <add>, %94, %cst_99 [1] : vector<16x130xf32> to vector<16xf32>
    %96 = vector.shape_cast %95 : vector<16xf32> to vector<16x1xf32>
    %cst_100 = arith.constant dense<0.000000e+00> : vector<16x1xf32>
    %97 = tpu.matmul %92, %96, %cst_100 {dimension_numbers = #tpu.dot_dimension_numbers<[1], [0], [0], [1], [0, 0, 1, 1], [], []>} : vector<16x16xf32>, vector<16x1xf32>, vector<16x1xf32> -> vector<16x1xf32>
    %cst_101 = arith.constant 3.906250e-03 : f32
    %98 = vector.broadcast %cst_101 : f32 to vector<16x1xf32>
    %99 = arith.mulf %97, %98 : vector<16x1xf32>
    %100 = vector.broadcast %99 : vector<16x1xf32> to vector<16x130xf32>
    %101 = arith.subf %89, %100 : vector<16x130xf32>
    %102 = vector.broadcast %0 : vector<1x130xf32> to vector<16x130xf32>
    %103 = arith.mulf %101, %102 : vector<16x130xf32>
    %104 = arith.mulf %103, %103 : vector<16x130xf32>
    %cst_102 = arith.constant dense<0.000000e+00> : vector<16xf32>
    %105 = vector.multi_reduction <add>, %104, %cst_102 [1] : vector<16x130xf32> to vector<16xf32>
    %106 = vector.shape_cast %105 : vector<16xf32> to vector<16x1xf32>
    %cst_103 = arith.constant dense<0.000000e+00> : vector<16x1xf32>
    %107 = tpu.matmul %92, %106, %cst_103 {dimension_numbers = #tpu.dot_dimension_numbers<[1], [0], [0], [1], [0, 0, 1, 1], [], []>} : vector<16x16xf32>, vector<16x1xf32>, vector<16x1xf32> -> vector<16x1xf32>
    %cst_104 = arith.constant 3.906250e-03 : f32
    %108 = vector.broadcast %cst_104 : f32 to vector<16x1xf32>
    %109 = arith.mulf %107, %108 : vector<16x1xf32>
    %110 = vector.broadcast %99 : vector<16x1xf32> to vector<16x130xf32>
    %111 = arith.subf %89, %110 : vector<16x130xf32>
    %cst_105 = arith.constant 9.99999974E-6 : f32
    %112 = vector.broadcast %cst_105 : f32 to vector<16x1xf32>
    %113 = arith.addf %109, %112 : vector<16x1xf32>
    %114 = math.rsqrt %113 : vector<16x1xf32>
    %115 = vector.broadcast %114 : vector<16x1xf32> to vector<16x130xf32>
    %116 = arith.mulf %111, %115 : vector<16x130xf32>
    %117 = vector.broadcast %90 : vector<16x1xf32> to vector<16x130xf32>
    %118 = arith.mulf %116, %117 : vector<16x130xf32>
    %119 = vector.broadcast %91 : vector<16x1xf32> to vector<16x130xf32>
    %120 = arith.addf %118, %119 : vector<16x130xf32>
    %121 = arith.negf %120 : vector<16x130xf32>
    %122 = math.exp %121 : vector<16x130xf32>
    %cst_106 = arith.constant 1.000000e+00 : f32
    %123 = vector.broadcast %cst_106 : f32 to vector<16x130xf32>
    %124 = arith.addf %123, %122 : vector<16x130xf32>
    %125 = arith.divf %123, %124 : vector<16x130xf32>
    %126 = arith.mulf %120, %125 : vector<16x130xf32>
    %c0_107 = arith.constant 0 : index
    %c0_108 = arith.constant 0 : index
    %127 = vector.load %arg7[%c0_107, %c0_108] : memref<8x16xf32, #tpu.memory_space<vmem>>, vector<8x16xf32>
    %cst_109 = arith.constant dense<0.000000e+00> : vector<8x130xf32>
    %128 = tpu.matmul %127, %126, %cst_109 {dimension_numbers = #tpu.dot_dimension_numbers<[1], [0], [0], [1], [0, 0, 1, 1], [], []>} : vector<8x16xf32>, vector<16x130xf32>, vector<8x130xf32> -> vector<8x130xf32>
    %c0_110 = arith.constant 0 : index
    %c0_111 = arith.constant 0 : index
    %129 = vector.load %arg8[%c0_110, %c0_111] : memref<8x1xf32, #tpu.memory_space<vmem>>, vector<8x1xf32>
    %130 = vector.broadcast %129 : vector<8x1xf32> to vector<8x130xf32>
    %131 = arith.addf %128, %130 : vector<8x130xf32>
    %132 = vector.extract_strided_slice %131 {offsets = [0, 0], sizes = [4, 130], strides = [1, 1]} : vector<8x130xf32> to vector<4x130xf32>
    %133 = vector.extract_strided_slice %131 {offsets = [4, 0], sizes = [4, 130], strides = [1, 1]} : vector<8x130xf32> to vector<4x130xf32>
    %134 = arith.mulf %132, %132 : vector<4x130xf32>
    %135 = math.exp %133 : vector<4x130xf32>
    %136 = arith.addf %134, %135 : vector<4x130xf32>
    %cst_112 = arith.constant 1.000000e+00 : f32
    %137 = vector.broadcast %cst_112 : f32 to vector<4x130xf32>
    %138 = arith.subf %136, %137 : vector<4x130xf32>
    %139 = arith.subf %138, %133 : vector<4x130xf32>
    %cst_113 = arith.constant 5.000000e-01 : f32
    %140 = vector.broadcast %cst_113 : f32 to vector<4x130xf32>
    %141 = arith.mulf %140, %139 : vector<4x130xf32>
    %cst_114 = arith.constant 5.000000e-01 : f32
    %142 = vector.broadcast %cst_114 : f32 to vector<4x130xf32>
    %143 = arith.mulf %142, %133 : vector<4x130xf32>
    %144 = math.exp %143 : vector<4x130xf32>
    %cst_115 = arith.constant 0.000000e+00 : f32
    %145 = vector.shape_cast %2 : vector<1x130xi1> to vector<1x130xi1>
    %146 = vector.broadcast %145 : vector<1x130xi1> to vector<4x130xi1>
    %147 = vector.broadcast %cst_115 : f32 to vector<4x130xf32>
    %148 = arith.select %146, %132, %147 : vector<4x130xi1>, vector<4x130xf32>
    %c0_116 = arith.constant 0 : index
    %c0_117 = arith.constant 0 : index
    %c0_118 = arith.constant 0 : index
    %149 = vector.load %arg12[%c0_116, %c0_117, %c0_118] : memref<1x4x130xf32, #tpu.memory_space<vmem>>, vector<1x4x130xf32>
    %150 = vector.shape_cast %149 : vector<1x4x130xf32> to vector<4x130xf32>
    %151 = vector.shape_cast %148 : vector<4x130xf32> to vector<1x4x130xf32>
    tpu.vector_store %arg12[%c0_116, %c0_117, %c0_118], %151 {strides = array<i32>} : memref<1x4x130xf32, #tpu.memory_space<vmem>>, vector<1x4x130xf32>,
    %cst_119 = arith.constant 0.000000e+00 : f32
    %152 = vector.shape_cast %2 : vector<1x130xi1> to vector<1x130xi1>
    %153 = vector.broadcast %152 : vector<1x130xi1> to vector<4x130xi1>
    %154 = vector.broadcast %cst_119 : f32 to vector<4x130xf32>
    %155 = arith.select %153, %144, %154 : vector<4x130xi1>, vector<4x130xf32>
    %c0_120 = arith.constant 0 : index
    %c0_121 = arith.constant 0 : index
    %c0_122 = arith.constant 0 : index
    %156 = vector.load %arg13[%c0_120, %c0_121, %c0_122] : memref<1x4x130xf32, #tpu.memory_space<vmem>>, vector<1x4x130xf32>
    %157 = vector.shape_cast %156 : vector<1x4x130xf32> to vector<4x130xf32>
    %158 = vector.shape_cast %155 : vector<4x130xf32> to vector<1x4x130xf32>
    tpu.vector_store %arg13[%c0_120, %c0_121, %c0_122], %158 {strides = array<i32>} : memref<1x4x130xf32, #tpu.memory_space<vmem>>, vector<1x4x130xf32>,
    %cst_123 = arith.constant 0.000000e+00 : f32
    %159 = vector.shape_cast %2 : vector<1x130xi1> to vector<1x130xi1>
    %160 = vector.broadcast %159 : vector<1x130xi1> to vector<4x130xi1>
    %161 = vector.broadcast %cst_123 : f32 to vector<4x130xf32>
    %162 = arith.select %160, %141, %161 : vector<4x130xi1>, vector<4x130xf32>
    %c0_124 = arith.constant 0 : index
    %c0_125 = arith.constant 0 : index
    %c0_126 = arith.constant 0 : index
    %163 = vector.load %arg14[%c0_124, %c0_125, %c0_126] : memref<1x4x130xf32, #tpu.memory_space<vmem>>, vector<1x4x130xf32>
    %164 = vector.shape_cast %163 : vector<1x4x130xf32> to vector<4x130xf32>
    %165 = vector.shape_cast %162 : vector<4x130xf32> to vector<1x4x130xf32>
    tpu.vector_store %arg14[%c0_124, %c0_125, %c0_126], %165 {strides = array<i32>} : memref<1x4x130xf32, #tpu.memory_space<vmem>>, vector<1x4x130xf32>,
    %c0_127 = arith.constant 0 : index
    %c0_128 = arith.constant 0 : index
    %166 = vector.load %arg10[%c0_127, %c0_128] : memref<16x4xf32, #tpu.memory_space<vmem>>, vector<16x4xf32>
    %cst_129 = arith.constant dense<0.000000e+00> : vector<16x130xf32>
    %167 = tpu.matmul %166, %148, %cst_129 {dimension_numbers = #tpu.dot_dimension_numbers<[1], [0], [0], [1], [0, 0, 1, 1], [], []>} : vector<16x4xf32>, vector<4x130xf32>, vector<16x130xf32> -> vector<16x130xf32>
    %c0_130 = arith.constant 0 : index
    %c0_131 = arith.constant 0 : index
    %168 = vector.load %arg11[%c0_130, %c0_131] : memref<16x1xf32, #tpu.memory_space<vmem>>, vector<16x1xf32>
    %169 = vector.broadcast %168 : vector<16x1xf32> to vector<16x130xf32>
    %170 = arith.addf %167, %169 : vector<16x130xf32>
    %cst_132 = arith.constant 0.000000e+00 : f32
    %171 = vector.shape_cast %2 : vector<1x130xi1> to vector<1x130xi1>
    %172 = vector.broadcast %171 : vector<1x130xi1> to vector<16x130xi1>
    %173 = vector.broadcast %cst_132 : f32 to vector<16x130xf32>
    %174 = arith.select %172, %170, %173 : vector<16x130xi1>, vector<16x130xf32>
    %cst_133 = arith.constant 0.000000e+00 : bf16
    %175 = vector.broadcast %cst_133 : bf16 to vector<16x43xbf16>
    %cst_134 = arith.constant 0.000000e+00 : bf16
    %176 = vector.broadcast %cst_134 : bf16 to vector<16x43xbf16>
    %177 = arith.truncf %174 : vector<16x130xf32> to vector<16x130xbf16>
    %c0_135 = arith.constant 0 : index
    %c0_136 = arith.constant 0 : index
    %c0_137 = arith.constant 0 : index
    %178 = vector.load %arg15[%c0_135, %c0_136, %c0_137] : memref<1x16x216xbf16, #tpu.memory_space<vmem>>, vector<1x16x43xbf16>
    %179 = vector.shape_cast %178 : vector<1x16x43xbf16> to vector<16x43xbf16>
    %180 = vector.shape_cast %175 : vector<16x43xbf16> to vector<1x16x43xbf16>
    tpu.vector_store %arg15[%c0_135, %c0_136, %c0_137], %180 {strides = array<i32>} : memref<1x16x216xbf16, #tpu.memory_space<vmem>>, vector<1x16x43xbf16>,
    %c0_138 = arith.constant 0 : index
    %c0_139 = arith.constant 0 : index
    %c43_140 = arith.constant 43 : index
    %181 = vector.load %arg15[%c0_138, %c0_139, %c43_140] : memref<1x16x216xbf16, #tpu.memory_space<vmem>>, vector<1x16x130xbf16>
    %182 = vector.shape_cast %181 : vector<1x16x130xbf16> to vector<16x130xbf16>
    %183 = vector.shape_cast %177 : vector<16x130xbf16> to vector<1x16x130xbf16>
    tpu.vector_store %arg15[%c0_138, %c0_139, %c43_140], %183 {strides = array<i32>} : memref<1x16x216xbf16, #tpu.memory_space<vmem>>, vector<1x16x130xbf16>,
    %c0_141 = arith.constant 0 : index
    %c0_142 = arith.constant 0 : index
    %c173 = arith.constant 173 : index
    %184 = vector.load %arg15[%c0_141, %c0_142, %c173] : memref<1x16x216xbf16, #tpu.memory_space<vmem>>, vector<1x16x43xbf16>
    %185 = vector.shape_cast %184 : vector<1x16x43xbf16> to vector<16x43xbf16>
    %186 = vector.shape_cast %176 : vector<16x43xbf16> to vector<1x16x43xbf16>
    tpu.vector_store %arg15[%c0_141, %c0_142, %c173], %186 {strides = array<i32>} : memref<1x16x216xbf16, #tpu.memory_space<vmem>>, vector<1x16x43xbf16>,
    return
  }
  func.func @transform_0(%arg0: i32) -> (i32, i32, i32) {
    %c0_i32 = arith.constant 0 : i32
    %c0_i32_0 = arith.constant 0 : i32
    %c0_i32_1 = arith.constant 0 : i32
    return %arg0, %c0_i32, %c0_i32_0 : i32, i32, i32
  }
  func.func @transform_1(%arg0: i32) -> (i32, i32) {
    %c0_i32 = arith.constant 0 : i32
    %c0_i32_0 = arith.constant 0 : i32
    %c0_i32_1 = arith.constant 0 : i32
    return %c0_i32, %c0_i32_0 : i32, i32
  }
  func.func @transform_2(%arg0: i32) -> (i32, i32) {
    %c0_i32 = arith.constant 0 : i32
    %c0_i32_0 = arith.constant 0 : i32
    %c0_i32_1 = arith.constant 0 : i32
    return %c0_i32, %c0_i32_0 : i32, i32
  }
  func.func @transform_3(%arg0: i32) -> (i32, i32) {
    %c0_i32 = arith.constant 0 : i32
    %c0_i32_0 = arith.constant 0 : i32
    %c0_i32_1 = arith.constant 0 : i32
    return %c0_i32, %c0_i32_0 : i32, i32
  }
  func.func @transform_4(%arg0: i32) -> (i32, i32) {
    %c0_i32 = arith.constant 0 : i32
    %c0_i32_0 = arith.constant 0 : i32
    %c0_i32_1 = arith.constant 0 : i32
    return %c0_i32, %c0_i32_0 : i32, i32
  }
  func.func @transform_5(%arg0: i32) -> (i32, i32) {
    %c0_i32 = arith.constant 0 : i32
    %c0_i32_0 = arith.constant 0 : i32
    %c0_i32_1 = arith.constant 0 : i32
    return %c0_i32, %c0_i32_0 : i32, i32
  }
  func.func @transform_6(%arg0: i32) -> (i32, i32) {
    %c0_i32 = arith.constant 0 : i32
    %c0_i32_0 = arith.constant 0 : i32
    %c0_i32_1 = arith.constant 0 : i32
    return %c0_i32, %c0_i32_0 : i32, i32
  }
  func.func @transform_7(%arg0: i32) -> (i32, i32) {
    %c0_i32 = arith.constant 0 : i32
    %c0_i32_0 = arith.constant 0 : i32
    %c0_i32_1 = arith.constant 0 : i32
    return %c0_i32, %c0_i32_0 : i32, i32
  }
  func.func @transform_8(%arg0: i32) -> (i32, i32) {
    %c0_i32 = arith.constant 0 : i32
    %c0_i32_0 = arith.constant 0 : i32
    %c0_i32_1 = arith.constant 0 : i32
    return %c0_i32, %c0_i32_0 : i32, i32
  }
  func.func @transform_9(%arg0: i32) -> (i32, i32) {
    %c0_i32 = arith.constant 0 : i32
    %c0_i32_0 = arith.constant 0 : i32
    %c0_i32_1 = arith.constant 0 : i32
    return %c0_i32, %c0_i32_0 : i32, i32
  }
  func.func @transform_10(%arg0: i32) -> (i32, i32) {
    %c0_i32 = arith.constant 0 : i32
    %c0_i32_0 = arith.constant 0 : i32
    %c0_i32_1 = arith.constant 0 : i32
    return %c0_i32, %c0_i32_0 : i32, i32
  }
  func.func @transform_11(%arg0: i32) -> (i32, i32, i32) {
    %c0_i32 = arith.constant 0 : i32
    %c0_i32_0 = arith.constant 0 : i32
    %c0_i32_1 = arith.constant 0 : i32
    return %arg0, %c0_i32, %c0_i32_0 : i32, i32, i32
  }
  func.func @transform_12(%arg0: i32) -> (i32, i32, i32) {
    %c0_i32 = arith.constant 0 : i32
    %c0_i32_0 = arith.constant 0 : i32
    %c0_i32_1 = arith.constant 0 : i32
    return %arg0, %c0_i32, %c0_i32_0 : i32, i32, i32
  }
  func.func @transform_13(%arg0: i32) -> (i32, i32, i32) {
    %c0_i32 = arith.constant 0 : i32
    %c0_i32_0 = arith.constant 0 : i32
    %c0_i32_1 = arith.constant 0 : i32
    return %arg0, %c0_i32, %c0_i32_0 : i32, i32, i32
  }
  func.func @transform_14(%arg0: i32) -> (i32, i32, i32) {
    %c0_i32 = arith.constant 0 : i32
    %c0_i32_0 = arith.constant 0 : i32
    %c0_i32_1 = arith.constant 0 : i32
    return %arg0, %c0_i32, %c0_i32_0 : i32, i32, i32
  }
}

</mosaic_0001>

<bundles_post_ra>
// kernel: tpu_custom_call.1
= control target key start
LH: loop header
LB: loop body
LE: loop exit
PB: predicated region body
PF: predicated region fallthrough
CT: control target
= control target key end

     0   :  { %s3007_s0 = inlined_call_operand.vmem [shape: bf16[2,16,216], index: 0, kind: input, shape index: {}]   ;;  %s3008_s1 = inlined_call_operand.vmem [shape: bf16[16,432], index: 1, kind: input, shape index: {}]   ;;  %s3009_s2 = inlined_call_operand.vmem [shape: f32[16,1], index: 2, kind: input, shape index: {}]   ;;  %s3010_s3 = inlined_call_operand.vmem [shape: f32[16,1], index: 3, kind: input, shape index: {}]   ;;  %s3011_s4 = inlined_call_operand.vmem [shape: f32[16,1], index: 4, kind: input, shape index: {}]   ;;  %s3012_s5 = inlined_call_operand.vmem [shape: f32[16,16], index: 5, kind: input, shape index: {}]   ;;  %s3013_s6 = inlined_call_operand.vmem [shape: f32[8,16], index: 6, kind: input, shape index: {}]   ;;  %s3014_s7 = inlined_call_operand.vmem [shape: f32[8,1], index: 7, kind: input, shape index: {}]   ;;  %s3015_s8 = inlined_call_operand.vmem [shape: f32[1,130], index: 8, kind: input, shape index: {}]   ;;  %s3016_s9 = inlined_call_operand.vmem [shape: f32[16,4], index: 9, kind: input, shape index: {}]   ;;  %s3017_s10 = inlined_call_operand.vmem [shape: f32[16,1], index: 10, kind: input, shape index: {}]   ;;  %s3018_s11 = inlined_call_operand.hbm [shape: f32[2,4,130], index: 11, kind: output, shape index: {0}]   ;;  %s3019_s12 = inlined_call_operand.hbm [shape: f32[2,4,130], index: 12, kind: output, shape index: {1}]   ;;  %s3020_s13 = inlined_call_operand.hbm [shape: f32[2,4,130], index: 13, kind: output, shape index: {2}]   ;;  %s3021_s14 = inlined_call_operand.hbm [shape: bf16[2,16,216], index: 14, kind: output, shape index: {3}]  }
   0x1   :  { %3027 = sst [smem:[#allocation13_spill]] %s3007_s0 }
   0x2   :  { %3028 = sst [smem:[#allocation14_spill]] %s3008_s1 }
   0x3   :  { %3029 = sst [smem:[#allocation15_spill]] %s3009_s2 }
   0x4   :  { %3030 = sst [smem:[#allocation16_spill]] %s3010_s3 }
   0x5   :  { %3031 = sst [smem:[#allocation17_spill]] %s3011_s4 }
   0x6   :  { %3032 = sst [smem:[#allocation18_spill]] %s3012_s5 }
   0x7   :  { %3033 = sst [smem:[#allocation19_spill]] %s3013_s6 }
   0x8   :  { %3034 = sst [smem:[#allocation20_spill]] %s3014_s7 }
   0x9   :  { %3035 = sst [smem:[#allocation21_spill]] %s3015_s8 }
   0xa   :  { %3036 = sst [smem:[#allocation22_spill]] %s3016_s9 }
   0xb   :  { %20 = vsyncpa [#allocation4], 0 }
   0xc   :  { %22 = vsyncpa [#allocation4 + $0x1], 0 }
   0xd   :  { %23 = vsyncpa [#allocation6], 0 }
   0xe   :  { %25 = vsyncpa [#allocation6 + $0x1], 0 }
   0xf   :  { %26 = vsyncpa [#allocation9], 0 }
  0x10   :  { %28 = vsyncpa [#allocation9 + $0x1], 0  ;;  %s2553_s29 = smov 0   ;;  %s2555_s30 = smov 0  }
  0x11   :  { %s2557_s15 = smov 0   ;;  %s2559_s16 = smov 0  }
  0x12 LB: > { %s2574_s17 = sadd.s32 4294967295, %s2442_s16   ;;  %s3022_s18 = sadd.s32 4294967294, %s2442_s16   ;;  %s2442_s16 = sphi %s2559_s16, %s3058_s16   ;;  %s2438_s15 = sphi %s2557_s15, %s3057_s15   ;;  %s2434_s30 = sphi %s2555_s30, %s3056_s30   ;;  %s2430_s29 = sphi %s2553_s29, %s3055_s29  }
  0x13   : > { %s2578_s19 = sadd.s32 1, %s2442_s16   ;;  %s277_s20 = sadd.s32 1, %s2438_s15 }
  0x14   : > { %s274_s21 = ssub.s32 %s2442_s16, %s2578_s19  ;;  %p287_p0 = scmp.ne.s32.totalorder %s2438_s15, %s2434_s30 }
  0x15   : > { %p275_p1 = scmp.eq.s32.totalorder %s274_s21, 0  ;;  %p288_p2 = scmp.eq.s32.totalorder %s2574_s17, 1 }
  0x16   : > { %p293_p3 = scmp.ne.s32.totalorder %s2434_s30, %s2430_s29  ;;  %p294_p4 = scmp.eq.s32.totalorder %s3022_s18, 1 }
  0x17   : > { %s2591_s22 = scalar_select %p275_p1, %s2438_s15, %s277_s20  }
  0x18   : > { %p2593_p5 = por %p288_p2, %p287_p0  ;;  %p2597_p6 = por %p294_p4, %p293_p3 }
  0x19   : > { %p2019_p7 = scmp.ge.s32.totalorder %s2442_s16, 1  ;;  %p428_p8 = scmp.lt.s32.totalorder %s2442_s16, 3 }
  0x1b   : > { %p429_p9 = pnand %p2019_p7, %p428_p8 }
  0x1c   : > { %p489_p10 = scmp.lt.s32.totalorder (!%p429_p9), %s2574_s17, 1  ;;  %s3039_s0 = sld [smem:[#allocation13_spill]] (!%p429_p9)  ;;  %vm510_vm0 = vcmask (!%p429_p9), 15360   ;;  %vm966_vm1 = vcmask (!%p429_p9), 392192   ;;  %v2470_v5 = vmov (!%p429_p9), 0   ;;  %vm546_vm2 = vcmask (!%p429_p9), 1031168  }
  0x1d   : > { %432 = sbr.rel (%p429_p9) target bundleno = 2166 (0x876), region = 64  ;;  %s2444_s21 = smov (!%p429_p9), 126   ;;  %2250 = vset.pattern.permute.xlu1 (!%p429_p9), %v2470_v5  ;;  %2249 = vset.pattern.permute.xlu0 (!%p429_p9), %v2470_v5  ;;  %vm526_vm3 = vcmask (!%p429_p9), 1039360   ;;  %vm566_vm4 = vcmask (!%p429_p9), 998400   ;;  %vm586_vm5 = vcmask (!%p429_p9), 990208   ;;  %vm606_vm6 = vcmask (!%p429_p9), 982016  }
  0x1e   : > { %s2445_s18 = smov (!%p429_p9), 127   ;;  %s2448_s27 = smov (!%p429_p9), 120   ;;  %vm826_vm7 = vcmask (!%p429_p9), 646144   ;;  %vm626_vm8 = vcmask (!%p429_p9), 949248   ;;  %vm846_vm9 = vcmask (!%p429_p9), 637952   ;;  %vm646_vm10 = vcmask (!%p429_p9), 941056  }
  0x1f   : > { %s2450_s28 = smov (!%p429_p9), 116   ;;  %s3040_s1 = sld [smem:[#allocation14_spill]] (!%p429_p9)  ;;  %vm866_vm11 = vcmask (!%p429_p9), 457728   ;;  %vm666_vm12 = vcmask (!%p429_p9), 932864   ;;  %vm886_vm13 = vcmask (!%p429_p9), 449536   ;;  %vm686_vm14 = vcmask (!%p429_p9), 752640  }
  0x20   : > { %s3041_s2 = sld [smem:[#allocation15_spill]] (!%p429_p9)  ;;  %vm906_vm15 = vcmask (!%p429_p9), 441344   ;;  %s3042_s8 = sld [smem:[#allocation21_spill]] (!%p429_p9) }
  0x21   : > { %s3043_s5 = sld [smem:[#allocation18_spill]] (!%p429_p9)  ;;  %s3044_s3 = sld [smem:[#allocation16_spill]] (!%p429_p9) }
  0x22   : > { %s3045_s4 = sld [smem:[#allocation17_spill]] (!%p429_p9)  ;;  %s3046_s7 = sld [smem:[#allocation20_spill]] (!%p429_p9) }
  0x23   : > { %s3047_s6 = sld [smem:[#allocation19_spill]] (!%p429_p9)  ;;  %s3048_s9 = sld [smem:[#allocation22_spill]] (!%p429_p9) }
  0x24   : > { %s490_s25 = scalar_select %p489_p10, %s2574_s17, 1 }
  0x25   : > { %v2256_v3 = vld [vmem:[%s3040_s1 + $0x4] ss:$16 sps:$4 sm:$0xff]   ;;  %v2259_v4 = vld [vmem:[%s3040_s1 + $0xc] ss:$16 sps:$4 sm:$0xff]  }
  0x26   : > { %s2116_s26 = sshll.u32 %s490_s25, 4  ;;  %s2446_s25 = smov 122   ;;  %1157 = vmatprep.mubr.bf16.mxu0 %v2256_v3  ;;  %2084 = vmatprep.mubr.msk.bf16.mxu1 %vm966_vm1, %v2259_v4  ;;  %v1091_v6 = vld [vmem:[%s3041_s2 + $0x8] sm:$0xff]  ;;  %v1090_v7 = vld [vmem:[%s3041_s2] sm:$0xff] }
  0x27   : > { %s493_s20 = scalar_lea.vmem %s3039_s0, %s2116_s26  ;;  %s2447_s26 = smov 121  }
  0x28   : > { %v2608_v0 = vld [vmem:[%s493_s20] ss:$8 sps:$4 sm:$0xff]   ;;  %v2610_v1 = vld [vmem:[%s493_s20 + $0x4] ss:$8 sps:$4 sm:$0xff]   ;;  %s2451_s20 = smov 78   ;;  %s2785_s2 = sand.u32 1, %s2434_s30  }
  0x29   : > { %542 = vrot.lane.b32.xlu1 %v2608_v0, %s2444_s21  ;;  %522 = vrot.lane.b32.xlu0 %v2608_v0, %s2445_s18  ;;  %511 = vst.msk [vmem:[#allocation2 + $0x8] sm:$0xff] %vm510_vm0, %v2610_v1 }
  0x2d   : > { %544 = vrot.lane.b32.xlu1 %v2610_v1, %s2444_s21  ;;  %524 = vrot.lane.b32.xlu0 %v2610_v1, %s2445_s18  ;;  %s2449_s18 = smov 79   ;;  %s2452_s21 = smov 115  }
  0x30   : > { %v1037_v2 = vld [vmem:[#allocation2 + $0x8] sm:$0xff] }
  0x31   : > { %564 = vrot.lane.b32.xlu1 %v2610_v1, %s2446_s25  ;;  %562 = vrot.lane.b32.xlu0 %v2608_v0, %s2446_s25  ;;  %s2453_s25 = smov 56  }
  0x32   : > { %1125 = vmatprep.subr.bf16.mxu0 %v1037_v2 }
  0x33   : > { %1126 = vmatpush1.bf16.msra.mxu0 %v2608_v0 }
  0x35   : > { %584 = vrot.lane.b32.xlu1 %v2610_v1, %s2447_s26  ;;  %582 = vrot.lane.b32.xlu0 %v2608_v0, %s2447_s26  ;;  %s2454_s26 = smov 114  }
  0x39   : > { %604 = vrot.lane.b32.xlu1 %v2610_v1, %s2448_s27  ;;  %602 = vrot.lane.b32.xlu0 %v2608_v0, %s2448_s27  ;;  %s2455_s27 = smov 55  }
  0x3d   : > { %824 = vrot.lane.b32.xlu1 %v2610_v1, %s2449_s18  ;;  %822 = vrot.lane.b32.xlu0 %v2608_v0, %s2449_s18  ;;  %s2456_s18 = smov 92  }
  0x41   : > { %624 = vrot.lane.b32.xlu1 %v2610_v1, %s2450_s28  ;;  %622 = vrot.lane.b32.xlu0 %v2608_v0, %s2450_s28  ;;  %s2457_s28 = smov 54  }
  0x45   : > { %844 = vrot.lane.b32.xlu1 %v2610_v1, %s2451_s20  ;;  %842 = vrot.lane.b32.xlu0 %v2608_v0, %s2451_s20  ;;  %s2458_s20 = smov 91  }
  0x49   : > { %644 = vrot.lane.b32.xlu1 %v2610_v1, %s2452_s21  ;;  %642 = vrot.lane.b32.xlu0 %v2608_v0, %s2452_s21  ;;  %s2459_s21 = smov 50  }
  0x4d   : > { %864 = vrot.lane.b32.xlu1 %v2610_v1, %s2453_s25  ;;  %862 = vrot.lane.b32.xlu0 %v2608_v0, %s2453_s25  ;;  %s2460_s25 = smov 90  }
  0x51   : > { %664 = vrot.lane.b32.xlu1 %v2610_v1, %s2454_s26  ;;  %662 = vrot.lane.b32.xlu0 %v2608_v0, %s2454_s26  ;;  %s2461_s26 = smov 49  }
  0x55   : > { %884 = vrot.lane.b32.xlu1 %v2610_v1, %s2455_s27  ;;  %882 = vrot.lane.b32.xlu0 %v2608_v0, %s2455_s27  ;;  %s2462_s27 = smov 86  }
  0x59   : > { %684 = vrot.lane.b32.xlu1 %v2610_v1, %s2456_s18  ;;  %682 = vrot.lane.b32.xlu0 %v2608_v0, %s2456_s18  ;;  %s2463_s18 = smov 48  }
  0x5d   : > { %904 = vrot.lane.b32.xlu1 %v2610_v1, %s2457_s28  ;;  %902 = vrot.lane.b32.xlu0 %v2608_v0, %s2457_s28  ;;  %s2464_s28 = smov 85  }
  0x61   : > { %704 = vrot.lane.b32.xlu1 %v2610_v1, %s2458_s20  ;;  %702 = vrot.lane.b32.xlu0 %v2608_v0, %s2458_s20  ;;  %s2465_s20 = smov 44  }
  0x65   : > { %924 = vrot.lane.b32.xlu1 %v2610_v1, %s2459_s21  ;;  %922 = vrot.lane.b32.xlu0 %v2608_v0, %s2459_s21  ;;  %s2466_s21 = smov 84  }
  0x69   : > { %724 = vrot.lane.b32.xlu1 %v2610_v1, %s2460_s25  ;;  %722 = vrot.lane.b32.xlu0 %v2608_v0, %s2460_s25  ;;  %s3023_s25 = smov 43  }
  0x6d   : > { %944 = vrot.lane.b32.xlu1 %v2610_v1, %s2461_s26  ;;  %942 = vrot.lane.b32.xlu0 %v2608_v0, %s2461_s26 }
  0x71   : > { %744 = vrot.lane.b32.xlu1 %v2610_v1, %s2462_s27  ;;  %742 = vrot.lane.b32.xlu0 %v2608_v0, %s2462_s27  ;;  %s1795_s27 = sand.u32 1, %s2574_s17  }
  0x75   : > { %964 = vrot.lane.b32.xlu1 %v2610_v1, %s2463_s18  ;;  %962 = vrot.lane.b32.xlu0 %v2608_v0, %s2463_s18  ;;  %s2468_s18 = smov 80  }
  0x79   : > { %764 = vrot.lane.b32.xlu1 %v2610_v1, %s2464_s28  ;;  %762 = vrot.lane.b32.xlu0 %v2608_v0, %s2464_s28  ;;  %s2842_s28 = sshll.u32 %s2574_s17, 7 }
  0x7d   : > { %984 = vrot.lane.b32.xlu1 %v2610_v1, %s2465_s20  ;;  %982 = vrot.lane.b32.xlu0 %v2608_v0, %s2465_s20  ;;  %s2860_s20 = scalar_lea.hbm %s3018_s11, %s2842_s28 }
  0x81   : > { %784 = vrot.lane.b32.xlu1 %v2610_v1, %s2466_s21  ;;  %782 = vrot.lane.b32.xlu0 %v2608_v0, %s2466_s21  ;;  %s2469_s21 = smov 42  }
  0x85   : > { %1004 = vrot.lane.b32.xlu1 %v2610_v1, %s3023_s25  ;;  %1002 = vrot.lane.b32.xlu0 %v2608_v0, %s3023_s25  ;;  %s2790_s25 = sshll.u32 %s2785_s2, 3 }
  0x86   : > { %s3025_s0 = scalar_lea.vmem [#allocation7], %s2790_s25 }
  0x89   : > { %804 = vrot.lane.b32.xlu1 %v2610_v1, %s2468_s18  ;;  %802 = vrot.lane.b32.xlu0 %v2608_v0, %s2468_s18  ;;  %s3026_s18 = scalar_lea.vmem [#allocation3], %s2790_s25 }
  0x8d   : > { %1024 = vrot.lane.b32.xlu1 %v2610_v1, %s2469_s21  ;;  %1022 = vrot.lane.b32.xlu0 %v2608_v0, %s2469_s21  ;;  %s474_s21 = scalar_lea.vmem [#allocation5], %s2790_s25 }
  0x91   : > { %1099 = vperm.xlu1 %2250, %v1091_v6   ;;  %1094 = vperm.xlu0 %2249, %v1090_v7  }
  0x9b   : > { %v543_v8 = vpop.permute.xlu1 %542  ;;  %v523_v9 = vpop.permute.xlu0 %522 }
  0x9f   : > { %v545_v10 = vpop.permute.xlu1 %544  ;;  %v525_v11 = vpop.permute.xlu0 %524 }
  0xa0   : > { %v547_v12 = vsel %vm546_vm2, %v543_v8, %v545_v10  ;;  %551 = vst.msk [vmem:[#allocation2 + $0x28] sm:$0xff] %vm510_vm0, %v545_v10  ;;  %v527_v13 = vsel %vm526_vm3, %v523_v9, %v525_v11  ;;  %531 = vst.msk [vmem:[#allocation2 + $0x18] sm:$0xff] %vm510_vm0, %v525_v11  ;;  %vm706_vm2 = vcmask 744448   ;;  %vm926_vm3 = vcmask 408576  }
  0xa3   : > { %v565_v14 = vpop.permute.xlu1 %564  ;;  %v563_v15 = vpop.permute.xlu0 %562 }
  0xa4   : > { %571 = vst.msk [vmem:[#allocation2 + $0x38] sm:$0xff] %vm510_vm0, %v565_v14  ;;  %v567_v16 = vsel %vm566_vm4, %v563_v15, %v565_v14  ;;  %vm726_vm4 = vcmask 736256  }
  0xa7   : > { %v585_v17 = vpop.permute.xlu1 %584  ;;  %v583_v18 = vpop.permute.xlu0 %582  ;;  %v1039_v19 = vld [vmem:[#allocation2 + $0x18] sm:$0xff]  ;;  %v1041_v21 = vld [vmem:[#allocation2 + $0x28] sm:$0xff] }
  0xa8   : > { %591 = vst.msk [vmem:[#allocation2 + $0x48] sm:$0xff] %vm510_vm0, %v585_v17  ;;  %v587_v20 = vsel %vm586_vm5, %v583_v18, %v585_v17  ;;  %1127 = vmatprep.subr.bf16.mxu0 %v1039_v19  ;;  %vm946_vm5 = vcmask 400384  }
  0xa9   : > { %1128 = vmatpush1.bf16.msra.mxu0 %v527_v13 }
  0xaa   : > { %1129 = vmatprep.subr.bf16.mxu0 %v1041_v21 }
  0xab   : > { %v605_v22 = vpop.permute.xlu1 %604  ;;  %v603_v23 = vpop.permute.xlu0 %602  ;;  %v1043_v25 = vld [vmem:[#allocation2 + $0x38] sm:$0xff] }
  0xac   : > { %611 = vst.msk [vmem:[#allocation2 + $0x58] sm:$0xff] %vm510_vm0, %v605_v22  ;;  %v607_v24 = vsel %vm606_vm6, %v603_v23, %v605_v22  ;;  %vm746_vm6 = vcmask 703488  }
  0xad   : > { %1130 = vmatpush1.bf16.msra.mxu0 %v547_v12 }
  0xae   : > { %1131 = vmatprep.subr.bf16.mxu0 %v1043_v25 }
  0xaf   : > { %v825_v26 = vpop.permute.xlu1 %824  ;;  %v823_v27 = vpop.permute.xlu0 %822  ;;  %v1045_v29 = vld [vmem:[#allocation2 + $0x48] sm:$0xff] }
  0xb0   : > { %831 = vst.msk [vmem:[#allocation2 + $0x108] sm:$0xff] %vm510_vm0, %v825_v26  ;;  %v827_v28 = vsel %vm826_vm7, %v823_v27, %v825_v26  ;;  %vm766_vm7 = vcmask 695296  }
  0xb1   : > { %1132 = vmatpush1.bf16.msra.mxu0 %v567_v16 }
  0xb2   : > { %1133 = vmatprep.subr.bf16.mxu0 %v1045_v29 }
  0xb3   : > { %v625_v30 = vpop.permute.xlu1 %624  ;;  %v623_v31 = vpop.permute.xlu0 %622  ;;  %v1047_v33 = vld [vmem:[#allocation2 + $0x58] sm:$0xff] }
  0xb4   : > { %631 = vst.msk [vmem:[#allocation2 + $0x68] sm:$0xff] %vm510_vm0, %v625_v30  ;;  %v627_v32 = vsel %vm626_vm8, %v623_v31, %v625_v30  ;;  %vm986_vm8 = vcmask 359424  }
  0xb5   : > { %1134 = vmatpush1.bf16.msra.mxu0 %v587_v20 }
  0xb6   : > { %1135 = vmatprep.subr.bf16.mxu0 %v1047_v33 }
  0xb7   : > { %v845_v34 = vpop.permute.xlu1 %844  ;;  %v843_v35 = vpop.permute.xlu0 %842  ;;  %v1069_v36 = vld [vmem:[#allocation2 + $0x108] sm:$0xff] }
  0xb8   : > { %851 = vst.msk [vmem:[#allocation2 + $0x118] sm:$0xff] %vm510_vm0, %v845_v34  ;;  %v847_v37 = vsel %vm846_vm9, %v843_v35, %v845_v34  ;;  %1168 = vmatprep.subr.bf16.mxu1 %v1069_v36  ;;  %vm1006_vm9 = vcmask 351232  }
  0xb9   : > { %1136 = vmatpush1.bf16.msra.mxu0 %v607_v24  ;;  %1169 = vmatpush1.bf16.msra.mxu1 %v827_v28 }
  0xbb   : > { %v645_v38 = vpop.permute.xlu1 %644  ;;  %v643_v39 = vpop.permute.xlu0 %642  ;;  %v1049_v40 = vld [vmem:[#allocation2 + $0x68] sm:$0xff] }
  0xbc   : > { %651 = vst.msk [vmem:[#allocation2 + $0x78] sm:$0xff] %vm510_vm0, %v645_v38  ;;  %v647_v41 = vsel %vm646_vm10, %v643_v39, %v645_v38  ;;  %1137 = vmatprep.subr.bf16.mxu0 %v1049_v40  ;;  %vm806_vm10 = vcmask 654336  }
  0xbd   : > { %1138 = vmatpush1.bf16.msra.mxu0 %v627_v32 }
  0xbf   : > { %v865_v42 = vpop.permute.xlu1 %864  ;;  %v863_v43 = vpop.permute.xlu0 %862  ;;  %v1071_v44 = vld [vmem:[#allocation2 + $0x118] sm:$0xff] }
  0xc0   : > { %871 = vst.msk [vmem:[#allocation2 + $0x128] sm:$0xff] %vm510_vm0, %v865_v42  ;;  %v867_v45 = vsel %vm866_vm11, %v863_v43, %v865_v42  ;;  %1170 = vmatprep.subr.bf16.mxu1 %v1071_v44  ;;  %vm1026_vm11 = vcmask 343040  }
  0xc1   : > { %1171 = vmatpush1.bf16.msra.mxu1 %v847_v37 }
  0xc3   : > { %v665_v46 = vpop.permute.xlu1 %664  ;;  %v663_v47 = vpop.permute.xlu0 %662  ;;  %v1051_v48 = vld [vmem:[#allocation2 + $0x78] sm:$0xff] }
  0xc4   : > { %671 = vst.msk [vmem:[#allocation2 + $0x88] sm:$0xff] %vm510_vm0, %v665_v46  ;;  %v667_v49 = vsel %vm666_vm12, %v663_v47, %v665_v46  ;;  %1139 = vmatprep.subr.bf16.mxu0 %v1051_v48  ;;  %v2254_v48 = vld [vmem:[%s3040_s1] ss:$16 sps:$4 sm:$0xff]   ;;  %vm1240_vm12 = vcmask 130048  }
  0xc5   : > { %1140 = vmatpush1.bf16.msra.mxu0 %v647_v41 }
  0xc7   : > { %v885_v50 = vpop.permute.xlu1 %884  ;;  %v883_v51 = vpop.permute.xlu0 %882  ;;  %v1073_v52 = vld [vmem:[#allocation2 + $0x128] sm:$0xff] }
  0xc8   : > { %891 = vst.msk [vmem:[#allocation2 + $0x138] sm:$0xff] %vm510_vm0, %v885_v50  ;;  %v887_v53 = vsel %vm886_vm13, %v883_v51, %v885_v50  ;;  %1172 = vmatprep.subr.bf16.mxu1 %v1073_v52  ;;  %v2257_v50 = vld [vmem:[%s3040_s1 + $0x8] ss:$16 sps:$4 sm:$0xff]   ;;  %v1218_v51 = vlaneseq  ;;  %s2023_s1 = sshll.u32 %s2785_s2, 4 }
  0xc9   : > { %1173 = vmatpush1.bf16.msra.mxu1 %v867_v45  ;;  %s2834_s26 = scalar_lea.vmem [#allocation8], %s2023_s1  ;;  %s2862_s1 = scalar_lea.sflag [#allocation6], %s1795_s27 }
  0xca   : > { %v2718_v52 = vshrl.u32 %v1218_v51, 7 }
  0xcb   : > { %v685_v54 = vpop.permute.xlu1 %684  ;;  %v683_v55 = vpop.permute.xlu0 %682  ;;  %v1053_v56 = vld [vmem:[#allocation2 + $0x88] sm:$0xff] }
  0xcc   : > { %691 = vst.msk [vmem:[#allocation2 + $0x98] sm:$0xff] %vm510_vm0, %v685_v54  ;;  %v687_v57 = vsel %vm686_vm14, %v683_v55, %v685_v54  ;;  %1141 = vmatprep.subr.bf16.mxu0 %v1053_v56  ;;  %v1224_v55 = vsub.s32 1, %v2718_v52 }
  0xcd   : > { %1142 = vmatpush1.bf16.msra.mxu0 %v667_v49 }
  0xcf   : > { %v905_v58 = vpop.permute.xlu1 %904  ;;  %v903_v59 = vpop.permute.xlu0 %902  ;;  %v1075_v60 = vld [vmem:[#allocation2 + $0x138] sm:$0xff] }
  0xd0   : > { %911 = vst.msk [vmem:[#allocation2 + $0x148] sm:$0xff] %vm510_vm0, %v905_v58  ;;  %v907_v61 = vsel %vm906_vm15, %v903_v59, %v905_v58  ;;  %1174 = vmatprep.subr.bf16.mxu1 %v1075_v60  ;;  %v2724_v58 = vld [vmem:[%s3042_s8] sm:$0x3]  ;;  %v1220_v59 = vsub.s32 0, %v2718_v52  ;;  %vm1635_vm15 = vcmask 1043456  }
  0xd1   : > { %1175 = vmatpush1.bf16.msra.mxu1 %v887_v53 }
  0xd3   : > { %v705_v62 = vpop.permute.xlu1 %704  ;;  %v703_v63 = vpop.permute.xlu0 %702  ;;  %v1055_v0 = vld [vmem:[#allocation2 + $0x98] sm:$0xff] }
  0xd4   : > { %711 = vst.msk [vmem:[#allocation2 + $0xa8] sm:$0xff] %vm510_vm0, %v705_v62  ;;  %v707_v1 = vsel %vm706_vm2, %v703_v63, %v705_v62  ;;  %1143 = vmatprep.subr.bf16.mxu0 %v1055_v0  ;;  %vm1636_vm2 = vcmask 15364  }
  0xd5   : > { %1144 = vmatpush1.bf16.msra.mxu0 %v687_v57 }
  0xd7   : > { %v925_v2 = vpop.permute.xlu1 %924  ;;  %v923_v3 = vpop.permute.xlu0 %922  ;;  %v1077_v4 = vld [vmem:[#allocation2 + $0x148] sm:$0xff] }
  0xd8   : > { %931 = vst.msk [vmem:[#allocation2 + $0x158] sm:$0xff] %vm510_vm0, %v925_v2  ;;  %v927_v6 = vsel %vm926_vm3, %v923_v3, %v925_v2  ;;  %1176 = vmatprep.subr.bf16.mxu1 %v1077_v4  ;;  %v1221_v4 = vrot.slane %v2724_v58, %v1220_v59  ;;  %vm1667_vm3 = vcmask 31744  }
  0xd9   : > { %1177 = vmatpush1.bf16.msra.mxu1 %v907_v61 }
  0xdb   : > { %v725_v7 = vpop.permute.xlu1 %724  ;;  %v723_v8 = vpop.permute.xlu0 %722  ;;  %v1057_v9 = vld [vmem:[#allocation2 + $0xa8] sm:$0xff] }
  0xdc   : > { %731 = vst.msk [vmem:[#allocation2 + $0xb8] sm:$0xff] %vm510_vm0, %v725_v7  ;;  %v727_v10 = vsel %vm726_vm4, %v723_v8, %v725_v7  ;;  %1145 = vmatprep.subr.bf16.mxu0 %v1057_v9  ;;  %vm2800_vm4 = vmor %vm1636_vm2, %vm1635_vm15 }
  0xdd   : > { %1146 = vmatpush1.bf16.msra.mxu0 %v707_v1  ;;  %v1225_v1 = vrot.slane %v2724_v58, %v1224_v55 }
  0xdf   : > { %v945_v11 = vpop.permute.xlu1 %944  ;;  %v943_v12 = vpop.permute.xlu0 %942  ;;  %v1079_v13 = vld [vmem:[#allocation2 + $0x158] sm:$0xff] }
  0xe0   : > { %951 = vst.msk [vmem:[#allocation2 + $0x168] sm:$0xff] %vm510_vm0, %v945_v11  ;;  %v947_v14 = vsel %vm946_vm5, %v943_v12, %v945_v11  ;;  %1178 = vmatprep.subr.bf16.mxu1 %v1079_v13  ;;  %vm1761_vm5 = vcmask 347136  }
  0xe1   : > { %1179 = vmatpush1.bf16.msra.mxu1 %v927_v6  ;;  %1762 = vst.msk [vmem:[%s2834_s26] sm:$0xf] %vm1761_vm5, %v2470_v5  ;;  %1763 = vst.msk [vmem:[%s2834_s26 + $0x8] sm:$0xf] %vm1761_vm5, %v2470_v5 }
  0xe3   : > { %v745_v15 = vpop.permute.xlu1 %744  ;;  %v743_v16 = vpop.permute.xlu0 %742  ;;  %v1059_v17 = vld [vmem:[#allocation2 + $0xb8] sm:$0xff] }
  0xe4   : > { %751 = vst.msk [vmem:[#allocation2 + $0xc8] sm:$0xff] %vm510_vm0, %v745_v15  ;;  %v747_v18 = vsel %vm746_vm6, %v743_v16, %v745_v15  ;;  %1147 = vmatprep.subr.bf16.mxu0 %v1059_v17 }
  0xe5   : > { %1148 = vmatpush1.bf16.msra.mxu0 %v727_v10 }
  0xe7   : > { %v965_v19 = vpop.permute.xlu1 %964  ;;  %v963_v20 = vpop.permute.xlu0 %962  ;;  %v1081_v21 = vld [vmem:[#allocation2 + $0x168] sm:$0xff] }
  0xe8   : > { %971 = vst.msk [vmem:[#allocation2 + $0x178] sm:$0xff] %vm510_vm0, %v965_v19  ;;  %v967_v22 = vsel %vm966_vm1, %v963_v20, %v965_v19  ;;  %1180 = vmatprep.subr.bf16.mxu1 %v1081_v21  ;;  %vm786_vm1 = vcmask 687104   ;;  %v1215_v21 = vld [vmem:[%s3043_s5] sm:$0xff] }
  0xe9   : > { %1181 = vmatpush1.bf16.msra.mxu1 %v947_v14 }
  0xeb   : > { %v765_v23 = vpop.permute.xlu1 %764  ;;  %v763_v24 = vpop.permute.xlu0 %762  ;;  %v1061_v25 = vld [vmem:[#allocation2 + $0xc8] sm:$0xff] }
  0xec   : > { %771 = vst.msk [vmem:[#allocation2 + $0xd8] sm:$0xff] %vm510_vm0, %v765_v23  ;;  %v767_v26 = vsel %vm766_vm7, %v763_v24, %v765_v23  ;;  %1149 = vmatprep.subr.bf16.mxu0 %v1061_v25  ;;  %v1216_v25 = vld [vmem:[%s3043_s5 + $0x8] sm:$0xff]  ;;  %s2472_s5 = smov [#allocation5]  }
  0xed   : > { %1150 = vmatpush1.bf16.msra.mxu0 %v747_v18 }
  0xef   : > { %v985_v27 = vpop.permute.xlu1 %984  ;;  %v983_v28 = vpop.permute.xlu0 %982  ;;  %v1083_v29 = vld [vmem:[#allocation2 + $0x178] sm:$0xff] }
  0xf0   : > { %991 = vst.msk [vmem:[#allocation2 + $0x188] sm:$0xff] %vm510_vm0, %v985_v27  ;;  %v987_v30 = vsel %vm986_vm8, %v983_v28, %v985_v27  ;;  %1182 = vmatprep.subr.bf16.mxu1 %v1083_v29 }
  0xf1   : > { %1183 = vmatpush1.bf16.msra.mxu1 %v967_v22 }
  0xf3   : > { %v785_v31 = vpop.permute.xlu1 %784  ;;  %v783_v32 = vpop.permute.xlu0 %782  ;;  %v1063_v33 = vld [vmem:[#allocation2 + $0xd8] sm:$0xff] }
  0xf4   : > { %791 = vst.msk [vmem:[#allocation2 + $0xe8] sm:$0xff] %vm510_vm0, %v785_v31  ;;  %v787_v34 = vsel %vm786_vm1, %v783_v32, %v785_v31  ;;  %1151 = vmatprep.subr.bf16.mxu0 %v1063_v33 }
  0xf5   : > { %1152 = vmatpush1.bf16.msra.mxu0 %v767_v26 }
  0xf7   : > { %v1005_v35 = vpop.permute.xlu1 %1004  ;;  %v1003_v36 = vpop.permute.xlu0 %1002  ;;  %v1085_v37 = vld [vmem:[#allocation2 + $0x188] sm:$0xff] }
  0xf8   : > { %1011 = vst.msk [vmem:[#allocation2 + $0x198] sm:$0xff] %vm510_vm0, %v1005_v35  ;;  %v1007_v38 = vsel %vm1006_vm9, %v1003_v36, %v1005_v35  ;;  %1184 = vmatprep.subr.bf16.mxu1 %v1085_v37 }
  0xf9   : > { %1185 = vmatpush1.bf16.msra.mxu1 %v987_v30 }
  0xfb   : > { %v805_v39 = vpop.permute.xlu1 %804  ;;  %v803_v40 = vpop.permute.xlu0 %802  ;;  %v1065_v41 = vld [vmem:[#allocation2 + $0xe8] sm:$0xff] }
  0xfc   : > { %811 = vst.msk [vmem:[#allocation2 + $0xf8] sm:$0xff] %vm510_vm0, %v805_v39  ;;  %v807_v42 = vsel %vm806_vm10, %v803_v40, %v805_v39  ;;  %1153 = vmatprep.subr.bf16.mxu0 %v1065_v41 }
  0xfd   : > { %1154 = vmatpush1.bf16.msra.mxu0 %v787_v34 }
  0xff   : > { %v1025_v43 = vpop.permute.xlu1 %1024  ;;  %v1023_v44 = vpop.permute.xlu0 %1022  ;;  %v1087_v45 = vld [vmem:[#allocation2 + $0x198] sm:$0xff] }
 0x100   : > { %1031 = vst.msk [vmem:[#allocation2 + $0x1a8] sm:$0xff] %vm510_vm0, %v1025_v43  ;;  %v1027_v46 = vsel %vm1026_vm11, %v1023_v44, %v1025_v43  ;;  %1186 = vmatprep.subr.bf16.mxu1 %v1087_v45 }
 0x101   : > { %1187 = vmatpush1.bf16.msra.mxu1 %v1007_v38 }
 0x103   : > { %v1067_v47 = vld [vmem:[#allocation2 + $0xf8] sm:$0xff] }
 0x104   : > { %1155 = vmatprep.subr.bf16.mxu0 %v1067_v47 }
 0x105   : > { %1156 = vmatpush1.bf16.msra.mxu0 %v807_v42 }
 0x107   : > { %v1089_v49 = vld [vmem:[#allocation2 + $0x1a8] sm:$0xff] }
 0x108   : > { %1158 = vmatmul.mubr.bf16.vlgmr.msra.gmra.mrb[0].mxu0 %v2254_v48  ;;  %1188 = vmatprep.subr.bf16.mxu1 %v1089_v49  ;;  %v1211_v48 = vld [vmem:[%s3044_s3] sm:$0xff]  ;;  %v1212_v49 = vld [vmem:[%s3044_s3 + $0x8] sm:$0xff] }
 0x109   : > { %1189 = vmatpush1.bf16.msra.mxu1 %v1027_v46 }
 0x10c   : > { %1201 = vmatmul.mubr.bf16.vlgmr.msra.gmra.mrb[0].mxu1 %v2257_v50 }
 0x10d   : > { %2135 = vmatprep.mubr.msk.f32.mxu1 %vm1240_vm12, %v1215_v21 }
 0x110   : > { %v1095_v53 = vpop.permute.xlu0 %1094  ;;  %v1100_v60 = vpop.permute.xlu1 %1099 }
 0x1db   : > { %v1159_v54 = vpop.f32.mrb[0].mxu0 }
 0x1dc   : > { %v1161_v56 = vpop.f32.mrb[1].mxu0  ;;  %v1160_v57 = vadd.f32 %v1159_v54, %v1095_v53 }
 0x1dd   : > { %v1162_v61 = vadd.f32 %v1161_v56, %v1095_v53  ;;  %v1163_v62 = vpop.f32.mrb[2].mxu0 }
 0x1de   : > { %v1165_v63 = vpop.f32.mrb[3].mxu0  ;;  %v1164_v2 = vadd.f32 %v1163_v62, %v1100_v60 }
 0x1df   : > { %v1202_v0 = vpop.f32.mrb[0].mxu1  ;;  %v1166_v7 = vadd.f32 %v1165_v63, %v1100_v60 }
 0x1e0   : > { %v1203_v3 = vadd.f32 %v1202_v0, %v1160_v57  ;;  %v1204_v6 = vpop.f32.mrb[1].mxu1 }
 0x1e1   : > { %v1205_v8 = vadd.f32 %v1204_v6, %v1162_v61  ;;  %v1206_v9 = vpop.f32.mrb[2].mxu1  ;;  %v1656_v6 = vld [vmem:[%s3017_s10 + $0x8] sm:$0xff] }
 0x1e2   : > { %v1207_v10 = vadd.f32 %v1206_v9, %v1164_v2  ;;  %v1208_v11 = vpop.f32.mrb[3].mxu1  ;;  %v1228_v14 = vmul.f32 %v1221_v4, %v1203_v3  ;;  %v1214_v2 = vld [vmem:[%s3045_s4 + $0x8] sm:$0xff] }
 0x1e3   : > { %v1229_v12 = vmul.f32 %v1225_v1, %v1205_v8  ;;  %v1209_v13 = vadd.f32 %v1208_v11, %v1166_v7  ;;  %v2471_v7 = vmov 0.0  }
 0x1e4   : > { %v1230_v17 = vmul.f32 %v1221_v4, %v1207_v10 }
 0x1e5   : > { %v1231_v15 = vmul.f32 %v1225_v1, %v1209_v13  ;;  %v1232_v16 = vsel %vm510_vm0, %v1229_v12, 0.0 }
 0x1e6   : > { %v1233_v18 = vadd.f32 %v1232_v16, %v1228_v14 }
 0x1e7   : > { %v1236_v19 = vsel %vm510_vm0, %v1231_v15, 0.0 }
 0x1e8   : > { %1234 = vadd.xlane.f32.xlu1 %v1233_v18  ;;  %v1237_v20 = vadd.f32 %v1236_v19, %v1230_v17 }
 0x1ea   : > { %1238 = vadd.xlane.f32.xlu0 %v1237_v20 }
 0x275   : > { %v1235_v22 = vpop.xlane.xlu1 %1234 }
 0x277   : > { %v1239_v23 = vpop.xlane.xlu0 %1238 }
 0x278   : > { %v2145_v24 = vpack.c.bf16 %v1239_v23, %v1235_v22 }
 0x27a   : > { %2146 = vmatprep.subr.bf16.mxu1 %v2145_v24 }
 0x27b   : > { %2148 = vmatpush3.bf16.msra.mxu1 %v2145_v24 }
 0x27e   : > { %2136 = vmatmul.mubr.msk.f32.vlgmr.msra.gmra.mrb[4].mxu1 %vm1240_vm12, %v1216_v25 }
 0x27f   : > { %2142 = vmatprep.mubr.msk.f32.mxu1 %vm1240_vm12, %v1215_v21 }
 0x351   : > { %v2137_v26 = vpop.f32.mrb[4].mxu1 }
 0x352   : > { %v1323_v27 = vmul.f32 0.00390625, %v2137_v26  ;;  %v1313_v28 = vpop.f32.mrb[5].mxu1 }
 0x353   : > { %v1322_v29 = vmul.f32 0.00390625, %v1313_v28 }
 0x354   : > { %1331 = vperm.xlu1 %2250, %v1323_v27  }
 0x355   : > { %1326 = vperm.xlu0 %2249, %v1322_v29  }
 0x3d3   : > { %v1332_v30 = vpop.permute.xlu1 %1331 }
 0x3d4   : > { %v1336_v31 = vsub.f32 %v1207_v10, %v1332_v30  ;;  %v1337_v32 = vsub.f32 %v1209_v13, %v1332_v30  ;;  %v1327_v33 = vpop.permute.xlu0 %1326 }
 0x3d5   : > { %v1334_v34 = vsub.f32 %v1203_v3, %v1327_v33  ;;  %v1335_v35 = vsub.f32 %v1205_v8, %v1327_v33  ;;  %v1506_v3 = vld [vmem:[%s3046_s7] sm:$0xff] }
 0x3d6   : > { %v1340_v36 = vmul.f32 %v1336_v31, %v1221_v4  ;;  %v1341_v37 = vmul.f32 %v1337_v32, %v1225_v1 }
 0x3d7   : > { %v1338_v38 = vmul.f32 %v1334_v34, %v1221_v4  ;;  %v1339_v39 = vmul.f32 %v1335_v35, %v1225_v1  ;;  %v1213_v1 = vld [vmem:[%s3045_s4] sm:$0xff] }
 0x3d8   : > { %v1345_v40 = vmul.f32 %v1341_v37, %v1341_v37  ;;  %v1344_v41 = vmul.f32 %v1340_v36, %v1340_v36  ;;  %v1655_v4 = vld [vmem:[%s3017_s10] sm:$0xff] }
 0x3d9   : > { %v1343_v42 = vmul.f32 %v1339_v39, %v1339_v39  ;;  %v1342_v43 = vmul.f32 %v1338_v38, %v1338_v38 }
 0x3da   : > { %v1350_v44 = vsel %vm510_vm0, %v1345_v40, 0.0 }
 0x3db   : > { %v1351_v45 = vadd.f32 %v1350_v44, %v1344_v41  ;;  %v1346_v46 = vsel %vm510_vm0, %v1343_v42, 0.0  ;;  %vm496_vm0 = vcmp.gt.f32.partialorder %v2724_v58, 0.0 }
 0x3dc   : > { %v1347_v47 = vadd.f32 %v1346_v46, %v1342_v43 }
 0x3dd   : > { %1352 = vadd.xlane.f32.xlu0 %v1351_v45 }
 0x3de   : > { %1348 = vadd.xlane.f32.xlu1 %v1347_v47 }
 0x3ef   : > { %1451 = vperm.xlu1 %2250, %v1211_v48   ;;  %v1505_v48 = vld [vmem:[%s3047_s6] sm:$0xff]  ;;  %s2292_s6 = sshll.u32 %s2472_s5, 4  ;;  %s2293_s6 = int_to_ptr.vmem [resolvable:$false] %s2292_s6 }
 0x3f0   : > { %s2294_s7 = scalar_lea.vmem %s2293_s6, 256 }
 0x3f3   : > { %1456 = vperm.xlu0 %2249, %v1212_v49   ;;  %v1618_v49 = vsel %vm496_vm0, 1, %v2470_v5 }
 0x46a   : > { %v1353_v50 = vpop.xlane.xlu0 %1352 }
 0x46b   : > { %v1349_v51 = vpop.xlane.xlu1 %1348 }
 0x46c   : > { %v2149_v53 = vpack.c.bf16 %v1353_v50, %v1349_v51  ;;  %v2778_v50 = vrot.slane %v1618_v49, %v1220_v59  ;;  %v2782_v51 = vrot.slane %v1618_v49, %v1224_v55 }
 0x46e   : > { %2150 = vmatprep.subr.bf16.mxu1 %v2149_v53  ;;  %vm1627_vm13 = vcmp.eq.s32.totalorder %v2778_v50, 1  ;;  %vm1628_vm14 = vcmp.eq.s32.totalorder %v2782_v51, 1 }
 0x46f   : > { %2152 = vmatpush3.bf16.msra.mxu1 %v2149_v53  ;;  %v1452_v8 = vpop.permute.xlu1 %1451 }
 0x472   : > { %2143 = vmatmul.mubr.msk.f32.vlgmr.msra.gmra.mrb[6].mxu1 %vm1240_vm12, %v1216_v25  ;;  %v1457_v9 = vpop.permute.xlu0 %1456 }
 0x473   : > { %1579 = vmatprep.mubr.f32.mxu1 %v2471_v7 }
 0x545   : > { %v2144_v54 = vpop.f32.mrb[6].mxu1 }
 0x546   : > { %v1430_v56 = vmul.f32 0.00390625, %v2144_v54  ;;  %v1420_v57 = vpop.f32.mrb[7].mxu1 }
 0x547   : > { %v1429_v60 = vmul.f32 0.00390625, %v1420_v57 }
 0x548   : > { %v1432_v61 = vadd.f32 1e-05, %v1430_v56 }
 0x549   : > { %v1431_v62 = vadd.f32 1e-05, %v1429_v60 }
 0x54a   : > { %2260 = vrsqrt.f32 %v1432_v61 }
 0x54b   : > { %2262 = vrsqrt.f32 %v1431_v62 }
 0x554   : > { %v2261_v63 = vpop.eup %2260 }
 0x555   : > { %v2263_v0 = vpop.eup %2262  ;;  %1442 = vperm.xlu1 %2250, %v2261_v63  }
 0x556   : > { %1437 = vperm.xlu0 %2249, %v2263_v0   ;;  %v1653_v0 = vld [vmem:[%s3048_s9] sm:$0xff] }
 0x559   : > { %1465 = vperm.xlu1 %2250, %v1213_v1  }
 0x55a   : > { %1470 = vperm.xlu0 %2249, %v1214_v2  }
 0x55d   : > { %1509 = vperm.xlu1 %2250, %v1506_v3  }
 0x55e   : > { %1659 = vperm.xlu0 %2249, %v1655_v4   ;;  %v1654_v4 = vld [vmem:[%s3048_s9 + $0x8] sm:$0xff] }
 0x561   : > { %1664 = vperm.xlu1 %2250, %v1656_v6  }
 0x5d4   : > { %v1443_v10 = vpop.permute.xlu1 %1442 }
 0x5d5   : > { %v1447_v11 = vmul.f32 %v1443_v10, %v1336_v31  ;;  %v1448_v12 = vmul.f32 %v1443_v10, %v1337_v32  ;;  %v1438_v13 = vpop.permute.xlu0 %1437 }
 0x5d6   : > { %v1445_v14 = vmul.f32 %v1438_v13, %v1334_v34  ;;  %v1446_v15 = vmul.f32 %v1438_v13, %v1335_v35 }
 0x5d7   : > { %v1461_v16 = vmul.f32 %v1457_v9, %v1447_v11  ;;  %v1462_v17 = vmul.f32 %v1457_v9, %v1448_v12 }
 0x5d8   : > { %v1466_v18 = vpop.permute.xlu1 %1465  ;;  %v1459_v19 = vmul.f32 %v1452_v8, %v1445_v14  ;;  %v1460_v20 = vmul.f32 %v1452_v8, %v1446_v15 }
 0x5d9   : > { %v1471_v21 = vpop.permute.xlu0 %1470 }
 0x5da   : > { %v1473_v22 = vadd.f32 %v1466_v18, %v1459_v19  ;;  %v1474_v23 = vadd.f32 %v1466_v18, %v1460_v20  ;;  %v1475_v24 = vadd.f32 %v1471_v21, %v1461_v16  ;;  %v1476_v25 = vadd.f32 %v1471_v21, %v1462_v17 }
 0x5dc   : > { %v2089_v26 = vmul.f32 -1.442695, %v1473_v22  ;;  %v2090_v27 = vmul.f32 -1.442695, %v1474_v23  ;;  %v2091_v28 = vmul.f32 -1.442695, %v1475_v24  ;;  %v1510_v53 = vpop.permute.xlu1 %1509 }
 0x5dd   : > { %v2092_v29 = vmul.f32 -1.442695, %v1476_v25 }
 0x5de   : > { %2264 = vpow2.f32 %v2089_v26 }
 0x5df   : > { %2266 = vpow2.f32 %v2090_v27 }
 0x5e0   : > { %2268 = vpow2.f32 %v2091_v28 }
 0x5e1   : > { %2270 = vpow2.f32 %v2092_v29 }
 0x5e8   : > { %v2265_v30 = vpop.eup %2264 }
 0x5e9   : > { %v2267_v31 = vpop.eup %2266  ;;  %v1489_v32 = vadd.f32 1.0, %v2265_v30  ;;  %v1660_v30 = vpop.permute.xlu0 %1659 }
 0x5ea   : > { %v2269_v33 = vpop.eup %2268  ;;  %v1490_v34 = vadd.f32 1.0, %v2267_v31 }
 0x5eb   : > { %v2271_v35 = vpop.eup %2270  ;;  %2272 = vrcp.f32 %v1489_v32  ;;  %v1491_v36 = vadd.f32 1.0, %v2269_v33 }
 0x5ec   : > { %2274 = vrcp.f32 %v1490_v34  ;;  %v1492_v37 = vadd.f32 1.0, %v2271_v35 }
 0x5ed   : > { %2276 = vrcp.f32 %v1491_v36  ;;  %v1665_v36 = vpop.permute.xlu1 %1664 }
 0x5ee   : > { %2278 = vrcp.f32 %v1492_v37 }
 0x5f5   : > { %v2273_v38 = vpop.eup %2272 }
 0x5f6   : > { %v2275_v39 = vpop.eup %2274  ;;  %v1501_v40 = vmul.f32 %v2273_v38, %v1473_v22 }
 0x5f7   : > { %v2277_v41 = vpop.eup %2276  ;;  %v1502_v42 = vmul.f32 %v2275_v39, %v1474_v23 }
 0x5f8   : > { %v2279_v43 = vpop.eup %2278  ;;  %v1503_v44 = vmul.f32 %v2277_v41, %v1475_v24 }
 0x5f9   : > { %v1504_v45 = vmul.f32 %v2279_v43, %v1476_v25 }
 0x5fa   : > { %v2155_v46 = vpack.c.bf16 %v1503_v44, %v1501_v40 }
 0x5fb   : > { %v2153_v47 = vpack.c.bf16 %v1504_v45, %v1502_v42 }
 0x5fd   : > { %2154 = vmatprep.subr.bf16.mxu1 %v2153_v47 }
 0x5fe   : > { %2156 = vmatpush1.bf16.msra.mxu1 %v2155_v46 }
 0x601   : > { %2093 = vmatmul.mubr.msk.f32.vlgmr.msra.gmra.mrb[8].mxu1 %vm1240_vm12, %v1505_v48 }
 0x602   : > { %1742 = vmatprep.mubr.f32.mxu1 %v2471_v7 }
 0x6d4   : > { %v1581_v54 = vpop.f32.mrb[8].mxu1 }
 0x6d5   : > { %v1582_v56 = vadd.f32 %v1581_v54, %v1510_v53  ;;  %v1583_v57 = vpop.f32.mrb[9].mxu1 }
 0x6d6   : > { %v1584_v58 = vadd.f32 %v1583_v57, %v1510_v53 }
 0x6d7   : > { %v1588_v59 = vmul.f32 1.442695, %v1582_v56  ;;  %v1612_v52 = vmul.f32 0.5, %v1582_v56  ;;  %v1629_v62 = vsel %vm1627_vm13, %v1582_v56, 0.0  ;;  %v1586_v9 = vmul.f32 %v1582_v56, %v1582_v56 }
 0x6d8   : > { %v1590_v55 = vmul.f32 1.442695, %v1584_v58  ;;  %v1613_v60 = vmul.f32 0.5, %v1584_v58  ;;  %v1630_v63 = vsel %vm1628_vm14, %v1584_v58, 0.0  ;;  %v1587_v12 = vmul.f32 %v1584_v58, %v1584_v58 }
 0x6d9   : > { %2280 = vpow2.f32 %v1588_v59  ;;  %v1614_v61 = vmul.f32 1.442695, %v1612_v52  ;;  %v1633_v3 = vcombine.low %v1629_v62, %v1630_v63  ;;  %2096 = vmatprep.subr.msk.mxu1 %vm1635_vm15, %v1630_v63  ;;  %v1604_v19 = vrot.slane %v1582_v56, 4 }
 0x6da   : > { %2282 = vpow2.f32 %v1590_v55  ;;  %v1616_v2 = vmul.f32 1.442695, %v1613_v60  ;;  %2097 = vmatpush1.msk.msra.mxu1 %vm1635_vm15, %v1629_v62  ;;  %v1605_v22 = vrot.slane %v1584_v58, 4 }
 0x6db   : > { %2284 = vpow2.f32 %v1614_v61  ;;  %2098 = vmatmul.mubr.msk.f32.vlgmr.msra.gmra.mrb[10].mxu1 %vm1667_vm3, %v1653_v0  ;;  %1638 = vst.msk [vmem:[%s3026_s18] sm:$0xff] %vm2800_vm4, %v1633_v3  ;;  %s1834_s18 = sshll.u32 %s474_s21, 4  ;;  %s2854_s18 = int_to_ptr.vmem [resolvable:$true] %s1834_s18 }
 0x6dc   : > { %2286 = vpow2.f32 %v1616_v2  ;;  %1748 = vmatprep.mubr.f32.mxu1 %v2471_v7  ;;  %p2295_p0 = scmp.lt.s32.totalorder %s2854_s18, %s2293_s6 }
 0x6df   : > { %2099 = vmatmul.mubr.msk.f32.gmra.mrb[12].mxu1 %vm1667_vm3, %v1654_v4 }
 0x6e3   : > { %v2281_v6 = vpop.eup %2280 }
 0x6e4   : > { %v2283_v8 = vpop.eup %2282  ;;  %v1594_v10 = vrot.slane %v2281_v6, 4 }
 0x6e5   : > { %v2285_v11 = vpop.eup %2284  ;;  %v1595_v13 = vrot.slane %v2283_v8, 4 }
 0x6e6   : > { %v2287_v14 = vpop.eup %2286  ;;  %v1598_v15 = vadd.f32 %v1594_v10, %v1586_v9  ;;  %v1639_v16 = vsel %vm1627_vm13, %v2285_v11, 0.0 }
 0x6e7   : > { %v1599_v7 = vadd.f32 %v1595_v13, %v1587_v12  ;;  %v1640_v17 = vsel %vm1628_vm14, %v2287_v14, 0.0 }
 0x6e8   : > { %v2094_v18 = vadd.f32 -1.0, %v1598_v15  ;;  %v1643_v20 = vcombine.high %v1639_v16, %v1640_v17 }
 0x6e9   : > { %v2095_v21 = vadd.f32 -1.0, %v1599_v7 }
 0x6ea   : > { %1645 = vst.msk [vmem:[%s474_s21] sm:$0xff] %vm2800_vm4, %v1643_v20  ;;  %v1608_v23 = vsub.f32 %v2094_v18, %v1604_v19  ;;  %s2288_s21 = scalar_lea.vmem %s2854_s18, 128 }
 0x6eb   : > { %v1609_v24 = vsub.f32 %v2095_v21, %v1605_v22  ;;  %p2289_p11 = scmp.ne.s32.totalorder %s2854_s18, %s2288_s21  ;;  %p2296_p1 = scmp.lt.s32.totalorder %s2294_s7, %s2288_s21 }
 0x6ec   : > { %v1610_v25 = vmul.f32 0.5, %v1608_v23 }
 0x6ed   : > { %v1611_v26 = vmul.f32 0.5, %v1609_v24  ;;  %p2290_p12 = pnand %p2289_p11, %p2593_p5  ;;  %p2297_p2 = por %p2296_p1, %p2295_p0 }
 0x6ee   : > { %v1646_v27 = vsel %vm1627_vm13, %v1610_v25, 0.0 }
 0x6ef   : > { %v1647_v28 = vsel %vm1628_vm14, %v1611_v26, 0.0  ;;  %p2291_p13 = pneg %p2290_p12 }
 0x6f0   : > { %v1650_v29 = vcombine.low %v1646_v27, %v1647_v28 }
 0x6f1   : > { %p2298_p3 = pnand %p2297_p2, %p2291_p13 }
 0x6f2   : > { %1652 = vst.msk [vmem:[%s3025_s0] sm:$0xff] %vm2800_vm4, %v1650_v29  ;;  %s2848_s0 = scalar_lea.hbm %s3019_s12, %s2842_s28 }
 0x7ae   : > { %v1744_v31 = vpop.f32.mrb[10].mxu1 }
 0x7af   : > { %v1745_v32 = vadd.f32 %v1744_v31, %v1660_v30  ;;  %v1746_v33 = vpop.f32.mrb[11].mxu1 }
 0x7b0   : > { %v1747_v34 = vadd.f32 %v1746_v33, %v1660_v30 }
 0x7b1   : > { %v1755_v35 = vsel %vm1627_vm13, %v1745_v32, 0.0 }
 0x7b2   : > { %v1756_v37 = vsel %vm1628_vm14, %v1747_v34, 0.0  ;;  %v1750_v38 = vpop.f32.mrb[12].mxu1 }
 0x7b3   : > { %v2117_v39 = vpack.c.bf16 %v1756_v37, %v1755_v35  ;;  %v1751_v40 = vadd.f32 %v1750_v38, %v1665_v36  ;;  %v1752_v41 = vpop.f32.mrb[13].mxu1 }
 0x7b4   : > { %2301 = shalt.err (!%p2298_p3)
}
 0x7b5   : > { %s2302_s3 = scalar_lea.hbm %s2848_s0, 128  ;;  %s2306_s5 = scalar_lea.hbm %s3019_s12, 256 }
 0x7b6   : > { %p2303_p4 = scmp.ne.s32.totalorder %s2848_s0, %s2302_s3  ;;  %p2307_p9 = scmp.lt.u32.totalorder %s2848_s0, %s3019_s12 }
 0x7b7   : > { %p2308_p10 = scmp.lt.u32.totalorder %s2306_s5, %s2302_s3  ;;  %p2310_p12 = scmp.lt.u32.totalorder %s2302_s3, %s2848_s0 }
 0x7b8   : > { %p2304_p7 = pnand %p2303_p4, %p2593_p5 }
 0x7b9   : > { %p2309_p11 = por %p2308_p10, %p2307_p9 }
 0x7ba   : > { %p2305_p8 = pneg %p2304_p7 }
 0x7bb   : > { %p2311_p13 = por %p2310_p12, %p2309_p11 }
 0x7bd   : > { %p2312_p0 = pnand %p2311_p13, %p2305_p8 }
 0x7bf   : > { %2315 = shalt.err (!%p2312_p0)
}
 0x7c0   : > { %2166 = dma.vmem_to_hbm [thread:$0]  (%p2593_p5), %s2854_s18, 128, %s2848_s0, %s2862_s1   ;;  %v1753_v42 = vadd.f32 %v1752_v41, %v1665_v36  ;;  %v1757_v43 = vsel %vm1627_vm13, %v1751_v40, 0.0 }
 0x7c1   : > { %s3051_s7 = scalar_lea.vmem [#allocation3], %s2790_s25  ;;  %s2892_s3 = scalar_lea.hbm %s3020_s13, %s2842_s28 }
 0x7c2   : > { %s1820_s8 = sshll.u32 %s3051_s7, 4  ;;  %s3052_s27 = smov 43   ;;  %v1758_v44 = vsel %vm1628_vm14, %v1753_v42, 0.0  ;;  %s2897_s8 = int_to_ptr.vmem [resolvable:$true] %s1820_s8 }
 0x7c3   : > { %1772 = vrot.lane.b32.xlu0 %v2117_v39, %s3052_s27  ;;  %s3053_s5 = scalar_lea.vmem [#allocation7], %s2790_s25  ;;  %s1791_s0 = scalar_lea.sflag [#allocation4], %s2785_s2 }
 0x7c4   : > { %s2901_s18 = sshll.u32 %s3053_s5, 4  ;;  %s2316_s6 = scalar_lea.vmem %s2897_s8, 128  ;;  %s1849_s18 = int_to_ptr.vmem [resolvable:$true] %s2901_s18 }
 0x7c5   : > { %p2317_p1 = scmp.ne.s32.totalorder %s2897_s8, %s2316_s6  ;;  %s2473_s28 = smov [#allocation3]  }
 0x7c6   : > { %s2320_s7 = sshll.u32 %s2473_s28, 4  ;;  %s2321_s7 = int_to_ptr.vmem [resolvable:$false] %s2320_s7 }
 0x7c7   : > { %p2318_p2 = pnand %p2317_p1, %p2593_p5  ;;  %s2322_s21 = scalar_lea.vmem %s2321_s7, 256 }
 0x7c8   : > { %p2323_p4 = scmp.lt.s32.totalorder %s2897_s8, %s2321_s7  ;;  %p2324_p7 = scmp.lt.s32.totalorder %s2322_s21, %s2316_s6 }
 0x7c9   : > { %p2319_p3 = pneg %p2318_p2 }
 0x7ca   : > { %p2325_p8 = por %p2324_p7, %p2323_p4 }
 0x7cc   : > { %p2326_p9 = pnand %p2325_p8, %p2319_p3 }
 0x7ce   : > { %2329 = shalt.err (!%p2326_p9)
}
 0x7cf   : > { %s2330_s25 = scalar_lea.hbm %s2860_s20, 128  ;;  %s2334_s28 = scalar_lea.hbm %s3018_s11, 256 }
 0x7d0   : > { %p2331_p10 = scmp.ne.s32.totalorder %s2860_s20, %s2330_s25  ;;  %p2335_p13 = scmp.lt.u32.totalorder %s2860_s20, %s3018_s11 }
 0x7d1   : > { %p2336_p0 = scmp.lt.u32.totalorder %s2334_s28, %s2330_s25  ;;  %p2338_p2 = scmp.lt.u32.totalorder %s2330_s25, %s2860_s20 }
 0x7d2   : > { %p2332_p11 = pnand %p2331_p10, %p2593_p5 }
 0x7d3   : > { %p2337_p1 = por %p2336_p0, %p2335_p13 }
 0x7d4   : > { %p2333_p12 = pneg %p2332_p11 }
 0x7d5   : > { %p2339_p3 = por %p2338_p2, %p2337_p1 }
 0x7d7   : > { %p2340_p4 = pnand %p2339_p3, %p2333_p12 }
 0x7d9   : > { %2343 = shalt.err (!%p2340_p4)
}
 0x7da   : > { %2165 = dma.vmem_to_hbm [thread:$0]  (%p2593_p5), %s2897_s8, 128, %s2860_s20, %s1791_s0   ;;  %v2118_v45 = vpack.c.bf16 %v1758_v44, %v1757_v43 }
 0x7db   : > { %s2344_s6 = scalar_lea.vmem %s1849_s18, 128  ;;  %s2474_s9 = smov [#allocation7]  }
 0x7dc   : > { %p2345_p7 = scmp.ne.s32.totalorder %s1849_s18, %s2344_s6  ;;  %s2348_s21 = sshll.u32 %s2474_s9, 4  ;;  %s2349_s21 = int_to_ptr.vmem [resolvable:$false] %s2348_s21 }
 0x7dd   : > { %s2350_s25 = scalar_lea.vmem %s2349_s21, 256  ;;  %p2351_p10 = scmp.lt.s32.totalorder %s1849_s18, %s2349_s21 }
 0x7de   : > { %p2346_p8 = pnand %p2345_p7, %p2593_p5  ;;  %p2352_p11 = scmp.lt.s32.totalorder %s2350_s25, %s2344_s6 }
 0x7e0   : > { %p2347_p9 = pneg %p2346_p8  ;;  %p2353_p12 = por %p2352_p11, %p2351_p10 }
 0x7e2   : > { %p2354_p13 = pnand %p2353_p12, %p2347_p9 }
 0x7e4   : > { %2357 = shalt.err (!%p2354_p13)
}
 0x7e5   : > { %s2358_s20 = scalar_lea.hbm %s2892_s3, 128  ;;  %s2362_s4 = scalar_lea.hbm %s3020_s13, 256 }
 0x7e6   : > { %p2359_p0 = scmp.ne.s32.totalorder %s2892_s3, %s2358_s20  ;;  %p2363_p3 = scmp.lt.u32.totalorder %s2892_s3, %s3020_s13 }
 0x7e7   : > { %p2364_p4 = scmp.lt.u32.totalorder %s2362_s4, %s2358_s20  ;;  %p2366_p8 = scmp.lt.u32.totalorder %s2358_s20, %s2892_s3 }
 0x7e8   : > { %p2360_p1 = pnand %p2359_p0, %p2593_p5 }
 0x7e9   : > { %p2365_p7 = por %p2364_p4, %p2363_p3 }
 0x7ea   : > { %p2361_p2 = pneg %p2360_p1 }
 0x7eb   : > { %p2367_p9 = por %p2366_p8, %p2365_p7 }
 0x7ed   : > { %p2368_p10 = pnand %p2367_p9, %p2361_p2 }
 0x7ef   : > { %2371 = shalt.err (!%p2368_p10)
}
 0x7f0   : > { %2167 = dma.vmem_to_hbm [thread:$0]  (%p2593_p5), %s1849_s18, 128, %s2892_s3, %s2862_s1   ;;  %1774 = vrot.lane.b32.xlu1 %v2118_v45, %s3052_s27  ;;  %vm1782_vm6 = vcmask 1043800   ;;  %vm1783_vm7 = vcmask 367620   ;;  %vm1787_vm1 = vcmask 716136  }
 0x7f1   : > { %vm1784_vm8 = vmor %vm1783_vm7, %vm1782_vm6  ;;  %s2122_s7 = sshll.u32 %s2574_s17, 8  ;;  %s1861_s6 = sshll.u32 %s2834_s26, 4  ;;  %s2958_s6 = int_to_ptr.vmem [resolvable:$true] %s1861_s6 }
 0x7f2   : > { %s2956_s27 = scalar_lea.hbm %s3021_s14, %s2122_s7  ;;  %s1806_s17 = scalar_lea.sflag [#allocation9], %s2785_s2 }
 0x7f3   : > { %s2372_s18 = scalar_lea.vmem %s2958_s6, 256  ;;  %s2475_s9 = smov [#allocation8]  }
 0x7f4   : > { %p2373_p11 = scmp.ne.s32.totalorder %s2958_s6, %s2372_s18  ;;  %s2376_s21 = sshll.u32 %s2475_s9, 4  ;;  %s2377_s21 = int_to_ptr.vmem [resolvable:$false] %s2376_s21 }
 0x7f5   : > { %s2378_s25 = scalar_lea.vmem %s2377_s21, 512  ;;  %p2379_p0 = scmp.lt.s32.totalorder %s2958_s6, %s2377_s21 }
 0x7f6   : > { %p2374_p12 = pnand %p2373_p11, %p2593_p5  ;;  %p2380_p1 = scmp.lt.s32.totalorder %s2378_s25, %s2372_s18 }
 0x7f8   : > { %p2375_p13 = pneg %p2374_p12  ;;  %p2381_p2 = por %p2380_p1, %p2379_p0 }
 0x7fa   : > { %p2382_p3 = pnand %p2381_p2, %p2375_p13 }
 0x835   : > { %v1773_v46 = vpop.permute.xlu0 %1772 }
 0x836   : > { %v1776_v47 = vrot.slane %v1773_v46, 4 }
 0x838   : > { %v1778_v48 = vsel %vm1006_vm9, %v1776_v47, %v1773_v46 }
 0x839   : > { %1785 = vst.msk [vmem:[%s2834_s26] sm:$0xff] %vm1784_vm8, %v1778_v48 }
 0x83a   : > { %1788 = vst.msk [vmem:[%s2834_s26 + $0x4] sm:$0xf] %vm1787_vm1, %v2470_v5 }
 0x862   : > { %v1775_v49 = vpop.permute.xlu1 %1774 }
 0x863   : > { %v1777_v50 = vrot.slane %v1775_v49, 4 }
 0x865   : > { %v1779_v51 = vsel %vm1006_vm9, %v1777_v50, %v1775_v49 }
 0x866   : > { %1786 = vst.msk [vmem:[%s2834_s26 + $0x8] sm:$0xff] %vm1784_vm8, %v1779_v51 }
 0x867   : > { %1789 = vst.msk [vmem:[%s2834_s26 + $0xc] sm:$0xf] %vm1787_vm1, %v2470_v5 }
 0x868   : > { %2385 = shalt.err (!%p2382_p3)
}
 0x869   : > { %s2386_s26 = scalar_lea.hbm %s2956_s27, 256  ;;  %s2390_s0 = scalar_lea.hbm %s3021_s14, 512 }
 0x86a   : > { %p2387_p4 = scmp.ne.s32.totalorder %s2956_s27, %s2386_s26  ;;  %p2391_p9 = scmp.lt.u32.totalorder %s2956_s27, %s3021_s14 }
 0x86b   : > { %p2392_p10 = scmp.lt.u32.totalorder %s2390_s0, %s2386_s26  ;;  %p2394_p12 = scmp.lt.u32.totalorder %s2386_s26, %s2956_s27 }
 0x86c   : > { %p2388_p7 = pnand %p2387_p4, %p2593_p5 }
 0x86d   : > { %p2393_p11 = por %p2392_p10, %p2391_p9 }
 0x86e   : > { %p2389_p8 = pneg %p2388_p7 }
 0x86f   : > { %p2395_p13 = por %p2394_p12, %p2393_p11 }
 0x871   : > { %p2396_p0 = pnand %p2395_p13, %p2389_p8 }
 0x873   : > { %2399 = shalt.err (!%p2396_p0)
}
 0x874   : > { %s2476_s28 = smov 128   ;;  %s2477_s7 = smov 8  }
 0x875   : > { %2168 = dma.vmem_to_hbm [thread:$0]  (%p2593_p5), %s2958_s6, 256, %s2956_s27, %s1806_s17, %s2476_s28, %s2476_s28, %s2477_s7  }
 0x876 PF: > { %p2186_p1 = scmp.ge.s32.totalorder %s2442_s16, 2  ;;  %s1876_s1 = sand.u32 1, %s2430_s29  }
 0x877   : > { %s1877_s3 = scalar_lea.sflag [#allocation4], %s1876_s1 }
 0x878   : > { %p2174_p2 = pnand %p2186_p1, %p2597_p6 }
 0x87a   : > { %2417 = dma.done.wait (!%p2174_p2), %s1877_s3, 128  }
 0x87b   : > { %2419 = vsyncadd (!%p2174_p2), %s1877_s3, 4294967168  ;;  %s3054_s18 = sadd.s32 4294967294, %s2442_s16  }
 0x87c   : > { %s1885_s9 = sand.u32 1, %s3054_s18  }
 0x87d   : > { %s1886_s21 = scalar_lea.sflag [#allocation6], %s1885_s9 }
 0x87e   : > { %2421 = dma.done.wait (!%p2174_p2), %s1886_s21, 256  }
 0x87f   : > { %2423 = vsyncadd (!%p2174_p2), %s1886_s21, 4294967040  ;;  %s1904_s23 = scalar_lea.sflag [#allocation9], %s1876_s1 }
 0x880   : > { %2425 = dma.done.wait (!%p2174_p2), %s1904_s23, 256  }
 0x881   : > { %2427 = vsyncadd (!%p2174_p2), %s1904_s23, 4294967040  ;;  %p31_p5 = scmp.ge.s32.totalorder %s2578_s19, 4   ;;  %s3055_s29 = smov %s2434_s30 }
 0x882   : > { %s3056_s30 = smov %s2438_s15  ;;  %s3057_s15 = smov %s2591_s22 }
 0x883   : > { %s3058_s16 = smov %s2578_s19  ;;  %33 = sbr.rel (!%p31_p5) target bundleno = 18 (0x12), region = 148 }
 0x88a   :  { %1909 = vsyncpa [#allocation4], 1 }
 0x88b   :  { %1911 = vsyncpa [#allocation4 + $0x1], 1 }
 0x88c   :  { %1912 = vsyncpa [#allocation6], 1 }
 0x88d   :  { %1914 = vsyncpa [#allocation6 + $0x1], 1 }
 0x88e   :  { %1915 = vsyncpa [#allocation9], 1 }
 0x88f   :  { %1917 = vsyncpa [#allocation9 + $0x1], 1 }

</bundles_post_ra>
